<compile_context>
chip_gen: v6e
topology: v6e:2x2x1
jax: 0.10.0
libtpu: 0.0.40
codegen_flags: <defaults>
</compile_context>

<pallas_src>
import jax
import jax.numpy as jnp
import numpy as np
from jax.experimental import pallas as pl
from jax.experimental.pallas import tpu as pltpu


def _round_up(x, m):
    return (x + m - 1) // m * m


def make_hierarchical_classifier(top2bottom_dict, input_dim, n_bottom_labels, key):
    """Builds deterministic params + a callable reproducing the PyTorch forward."""
    n_top = len(top2bottom_dict)
    # The PyTorch module indexes top_scores[:, i] for i in range(n_top) and
    # looks up 'lin_%d' % i, so keys must be exactly 0..n_top-1.
    assert sorted(top2bottom_dict.keys()) == list(range(n_top)), (
        "top2bottom_dict keys must be exactly 0..n_top-1")

    # ---- deterministic parameter init (uniform in [-0.2, 0.2], like init_weight) ----
    def uniform(k, shape):
        return jax.random.uniform(k, shape, jnp.float32, minval=-0.2, maxval=0.2)

    keys = jax.random.split(key, 2 + 2 * n_top)
    w_top = uniform(keys[0], (input_dim, n_top))       # (D, n_top), transposed vs nn.Linear
    b_top = uniform(keys[1], (1, n_top))

    group_slices, group_keys = [], []
    w_bot_parts, b_bot_parts = [], []
    col = 0
    for k in range(n_top):
        v = top2bottom_dict[k]
        if len(v) >= 2:
            nk = len(v)
            w_bot_parts.append(uniform(keys[2 + 2 * k], (input_dim, nk)))
            b_bot_parts.append(uniform(keys[3 + 2 * k], (1, nk)))
            group_slices.append((col, col + nk))
            group_keys.append(k)
            col += nk
    C = col
    n_groups = len(group_slices)
    assert C >= 1, "need at least one top label with >= 2 bottom labels"
    w_bot = jnp.concatenate(w_bot_parts, axis=1)        # (D, C)
    b_bot = jnp.concatenate(b_bot_parts, axis=1)        # (1, C)

    # ---------------- padded / fused device-side constants ----------------
    D_PAD   = _round_up(input_dim, 128)
    TOP_PAD = _round_up(n_top, 128)
    C_PAD   = _round_up(C, 128)
    NB_PAD  = _round_up(n_bottom_labels, 128)
    G_PAD   = _round_up(n_groups, 128)   # lane-dense group axis (K=128 matmuls)
    NF      = TOP_PAD + C_PAD            # fused projection width (lane-dense)
    OUT_W   = TOP_PAD + C_PAD + NB_PAD   # lane-dense output slab width

    # Fused projection weight/bias: lanes [0,TOP_PAD)=top, [TOP_PAD,TOP_PAD+C)=bottom.
    w_fused_np = np.zeros((D_PAD, NF), np.float32)
    b_fused_np = np.zeros((1, NF), np.float32)
    w_fused_np[:input_dim, :n_top] = np.asarray(w_top)
    w_fused_np[:input_dim, TOP_PAD:TOP_PAD + C] = np.asarray(w_bot)
    b_fused_np[:, :n_top] = np.asarray(b_top)
    b_fused_np[:, TOP_PAD:TOP_PAD + C] = np.asarray(b_bot)
    w_fused = jnp.asarray(w_fused_np, jnp.bfloat16)     # bf16 feed for the MXU
    b_fused = jnp.asarray(b_fused_np, jnp.float32)

    # Group membership (one-hot) + valid-column mask for the whole-row softmax.
    member_np = np.zeros((G_PAD, C_PAD), np.float32)
    for g, (s, e) in enumerate(group_slices):
        member_np[g, s:e] = 1.0
    valid_np = np.zeros((1, C_PAD), np.float32)
    valid_np[:, :C] = 1.0

    # One-hot selectors for the hierarchical combine.
    s_top_np = np.zeros((TOP_PAD, NB_PAD), np.float32)      # parent selector
    s_bot_np = np.zeros((C_PAD, NB_PAD), np.float32)        # softmax-column selector
    singleton_np = np.zeros((1, NB_PAD), np.float32)        # 1.0 where no softmax
    for k in range(n_top):
        v = top2bottom_dict[k]
        for j in v:
            s_top_np[k, j] = 1.0
        if len(v) >= 2:
            start, _ = group_slices[group_keys.index(k)]
            for local, j in enumerate(v):
                s_bot_np[start + local, j] = 1.0
        else:
            for j in v:
                singleton_np[0, j] = 1.0

    # One-hot values are exact in bf16: halve the bytes of the big constants.
    member    = jnp.asarray(member_np, jnp.bfloat16)
    member_t  = jnp.asarray(member_np.T.copy(), jnp.bfloat16)
    valid     = jnp.asarray(valid_np, jnp.float32)
    s_top_sel = jnp.asarray(s_top_np, jnp.bfloat16)
    s_bot_sel = jnp.asarray(s_bot_np, jnp.bfloat16)
    singleton = jnp.asarray(singleton_np, jnp.float32)

    # ---------------------------- the Pallas kernel ----------------------------
    def kernel(f_ref, w_ref, b_ref, member_ref, member_t_ref,
               valid_ref, s_top_ref, s_bot_ref, single_ref, out_ref):
        # Fused top+bottom projection: bf16 MXU feed, f32 accumulation.
        logits = jnp.dot(f_ref[...], w_ref[...],
                         preferred_element_type=jnp.float32) + b_ref[...]
        top_logits = logits[:, :TOP_PAD]           # (TB, TOP_PAD), 128-aligned slice
        bot_logits = logits[:, TOP_PAD:]           # (TB, C_PAD)

        # Sigmoid: exp on EUP + approx reciprocal (no VALU divide chain).
        top_scores = pl.reciprocal(1.0 + jnp.exp(-top_logits), approx=True)

        # Per-group softmax on the whole (TB, C_PAD) row:
        #   - ONE row-global masked max (softmax is shift-invariant per group,
        #     so the row max is an exact substitute for the per-group max),
        #   - group sums / broadcasts via bf16 one-hot membership matmuls (MXU),
        #   - divides via EUP approx reciprocal.
        v = valid_ref[...]                                               # (1, C_PAD)
        row_max = jnp.max(jnp.where(v > 0, bot_logits, -1e30),
                          axis=-1, keepdims=True)                        # (TB, 1)
        ex = jnp.exp(bot_logits - row_max) * v                           # (TB, C_PAD) f32
        denom = jnp.dot(ex.astype(jnp.bfloat16), member_t_ref[...],
                        preferred_element_type=jnp.float32)              # (TB, G_PAD)
        denom_b = jnp.dot(denom.astype(jnp.bfloat16), member_ref[...],
                          preferred_element_type=jnp.float32)            # (TB, C_PAD)
        soft = ex * pl.reciprocal(denom_b + (1.0 - v), approx=True)      # (TB, C_PAD)

        # final[:, j] = top_scores[:, parent(j)] * (softmax col or 1.0)
        parent = jnp.dot(top_scores.astype(jnp.bfloat16), s_top_ref[...],
                         preferred_element_type=jnp.float32)             # (TB, NB_PAD)
        child = jnp.dot(soft.astype(jnp.bfloat16), s_bot_ref[...],
                        preferred_element_type=jnp.float32) + single_ref[...]
        final = parent * child

        # One lane-dense [top | soft | final] slab: 128-aligned unmasked stores.
        out_ref[:, :TOP_PAD] = top_scores
        out_ref[:, TOP_PAD:TOP_PAD + C_PAD] = soft
        out_ref[:, TOP_PAD + C_PAD:] = final

    # Resident constant bytes (single-buffered) and per-tile footprint estimate.
    RESIDENT_BYTES = (D_PAD * NF * 2 + NF * 4                 # fused weight (bf16) + bias
                      + 2 * G_PAD * C_PAD * 2                 # member + member_t (bf16)
                      + C_PAD * 4                             # valid mask
                      + (TOP_PAD + C_PAD) * NB_PAD * 2        # selectors (bf16)
                      + NB_PAD * 4)                           # singleton mask

    def _vmem_est(tb):
        io = 2 * tb * D_PAD * 2 + 2 * tb * OUT_W * 4          # double-buffered tiles
        interm = tb * (NF + 4 * C_PAD + 3 * NB_PAD) * 4       # f32 intermediates
        return io + RESIDENT_BYTES + interm

    def forward(features):
        B = features.shape[0]

        # Per-chip VMEM budget: ~20% headroom below physical (v7x: 64 MiB phys).
        try:
            vmem_phys = int(pltpu.get_tpu_info().vmem_capacity_bytes)
        except Exception:
            vmem_phys = 64 * 1024 * 1024
        budget = int(vmem_phys * 0.8)
        max_block = 1024 if vmem_phys >= 96 * 1024 * 1024 else 512

        # Pick the batch tile: start big, shrink until the estimate fits the
        # budget, and prefer >= 2 grid steps (megacore + pipelining) when the
        # batch is large enough.
        TB = min(max_block, _round_up(B, 8))
        while TB > 8 and _vmem_est(TB) > budget:
            TB = _round_up(TB // 2, 8)
        if _round_up(B, TB) // TB < 2 and _round_up(B, 8) >= 16:
            TB = max(8, _round_up(_round_up(B, 8) // 2, 8))
        Bp = _round_up(B, TB)

        # Pad in the original dtype, single cast to bf16 for the MXU feed.
        f = jnp.pad(features, ((0, Bp - B), (0, D_PAD - input_dim))
                    ).astype(jnp.bfloat16)

        vmem_limit = int(min(budget, max(2 * _vmem_est(TB), 32 * 1024 * 1024)))

        def run(single_buffer_residents):
            if single_buffer_residents:
                resident = lambda shape: pl.BlockSpec(
                    shape, lambda i: (0,) * len(shape),
                    pipeline_mode=pl.Buffered(1))
            else:
                resident = lambda shape: pl.BlockSpec(
                    shape, lambda i: (0,) * len(shape))
            return pl.pallas_call(
                kernel,
                grid=(Bp // TB,),
                in_specs=[
                    pl.BlockSpec((TB, D_PAD), lambda i: (i, 0)),  # batch-tiled features
                    resident((D_PAD, NF)),        # fused projection weight (bf16)
                    resident((1, NF)),            # fused bias
                    resident((G_PAD, C_PAD)),     # group membership one-hot (bf16)
                    resident((C_PAD, G_PAD)),     # membership transpose (bf16)
                    resident((1, C_PAD)),         # valid-column mask
                    resident((TOP_PAD, NB_PAD)),  # parent selector (bf16)
                    resident((C_PAD, NB_PAD)),    # softmax-column selector (bf16)
                    resident((1, NB_PAD)),        # singleton mask
                ],
                out_specs=pl.BlockSpec((TB, OUT_W), lambda i: (i, 0)),
                out_shape=jax.ShapeDtypeStruct((Bp, OUT_W), jnp.float32),
                compiler_params=pltpu.CompilerParams(
                    dimension_semantics=("parallel",),
                    vmem_limit_bytes=vmem_limit),
            )(f, w_fused, b_fused, member, member_t, valid,
              s_top_sel, s_bot_sel, singleton)

        try:
            out = run(True)
        except Exception:
            # Fallback: some jax builds reject Buffered(1); use default
            # double-buffering for the resident params (correctness identical).
            out = run(False)

        # glue: trim padding and split the concatenated softmax back into the dict
        top_scores = out[:B, :n_top]
        soft = out[:B, TOP_PAD:TOP_PAD + C]
        final_scores = out[:B, TOP_PAD + C_PAD:TOP_PAD + C_PAD + n_bottom_labels]
        bottom_scores_dict = {'lin_%d' % k: soft[:, s:e]
                              for k, (s, e) in zip(group_keys, group_slices)}
        return top_scores, bottom_scores_dict, final_scores

    # Pure-JAX reference of the module semantics (same bf16 projection feed,
    # per-group slice softmax, exact reciprocals) for the correctness check.
    def reference(features):
        fb = features.astype(jnp.bfloat16)
        top_scores = jax.nn.sigmoid(
            jnp.dot(fb, w_top.astype(jnp.bfloat16),
                    preferred_element_type=jnp.float32) + b_top)
        bot_logits = jnp.dot(fb, w_bot.astype(jnp.bfloat16),
                             preferred_element_type=jnp.float32) + b_bot
        parts = [jax.nn.softmax(bot_logits[:, s:e], axis=1)
                 for (s, e) in group_slices]
        soft = jnp.concatenate(parts, axis=1)
        final = ((top_scores @ s_top_sel[:n_top, :n_bottom_labels].astype(jnp.float32))
                 * (soft @ s_bot_sel[:C, :n_bottom_labels].astype(jnp.float32)
                    + singleton[:, :n_bottom_labels]))
        return top_scores, soft, final

    return forward, reference


if __name__ == "__main__":
    # small, deterministic example consistent with the module's forward
    top2bottom_dict = {0: [0, 1, 2], 1: [3, 4], 2: [5], 3: [6, 7, 8, 9]}
    input_dim = 32
    n_bottom_labels = 10
    batch = 2

    key = jax.random.PRNGKey(0)
    k_param, k_feat = jax.random.split(key)
    features = jax.random.normal(k_feat, (batch, input_dim), jnp.float32)

    forward, reference = make_hierarchical_classifier(
        top2bottom_dict, input_dim, n_bottom_labels, k_param)

    top_scores, bottom_scores_dict, final_scores = forward(features)
    jax.block_until_ready(final_scores)

    # correctness check (tolerance absorbs bf16 MXU feed + EUP approx reciprocal)
    ref_top, ref_soft, ref_final = reference(features)
    tol = dict(rtol=1e-2, atol=1e-2)
    np.testing.assert_allclose(np.asarray(top_scores), np.asarray(ref_top), **tol)
    got_soft = np.concatenate(
        [np.asarray(bottom_scores_dict['lin_%d' % k]) for k in [0, 1, 3]], axis=1)
    np.testing.assert_allclose(got_soft, np.asarray(ref_soft), **tol)
    np.testing.assert_allclose(np.asarray(final_scores), np.asarray(ref_final), **tol)

    print("KERNEL_OK")
</pallas_src>

<mosaic_0001>
module attributes {stable_mosaic.version = 11 : i64} {
  func.func @kernel(%arg0: i32, %arg1: memref<8x128xbf16, #tpu.memory_space<vmem>>, %arg2: memref<128x256xbf16, #tpu.memory_space<vmem>>, %arg3: memref<1x256xf32, #tpu.memory_space<vmem>>, %arg4: memref<128x128xbf16, #tpu.memory_space<vmem>>, %arg5: memref<128x128xbf16, #tpu.memory_space<vmem>>, %arg6: memref<1x128xf32, #tpu.memory_space<vmem>>, %arg7: memref<128x128xbf16, #tpu.memory_space<vmem>>, %arg8: memref<128x128xbf16, #tpu.memory_space<vmem>>, %arg9: memref<1x128xf32, #tpu.memory_space<vmem>>, %arg10: memref<8x384xf32, #tpu.memory_space<vmem>>) attributes {dimension_semantics = [#tpu.dimension_semantics<parallel>], iteration_bounds = array<i64: 1>, scalar_prefetch = 0 : i64, scratch_operands = 0 : i64, tpu.core_type = #tpu.core_type<tc>, window_params = [{transform_indices = @transform_0, window_bounds = array<i64: 8, 128>}, {pipeline_mode = #tpu.pipeline_mode<synchronous>, transform_indices = @transform_1, window_bounds = array<i64: 128, 256>}, {pipeline_mode = #tpu.pipeline_mode<synchronous>, transform_indices = @transform_2, window_bounds = array<i64: 1, 256>}, {pipeline_mode = #tpu.pipeline_mode<synchronous>, transform_indices = @transform_3, window_bounds = array<i64: 128, 128>}, {pipeline_mode = #tpu.pipeline_mode<synchronous>, transform_indices = @transform_4, window_bounds = array<i64: 128, 128>}, {pipeline_mode = #tpu.pipeline_mode<synchronous>, transform_indices = @transform_5, window_bounds = array<i64: 1, 128>}, {pipeline_mode = #tpu.pipeline_mode<synchronous>, transform_indices = @transform_6, window_bounds = array<i64: 128, 128>}, {pipeline_mode = #tpu.pipeline_mode<synchronous>, transform_indices = @transform_7, window_bounds = array<i64: 128, 128>}, {pipeline_mode = #tpu.pipeline_mode<synchronous>, transform_indices = @transform_8, window_bounds = array<i64: 1, 128>}, {transform_indices = @transform_9, window_bounds = array<i64: 8, 384>}]} {
    %c0 = arith.constant 0 : index
    %c0_0 = arith.constant 0 : index
    %0 = vector.load %arg1[%c0, %c0_0] : memref<8x128xbf16, #tpu.memory_space<vmem>>, vector<8x128xbf16>
    %c0_1 = arith.constant 0 : index
    %c0_2 = arith.constant 0 : index
    %1 = vector.load %arg2[%c0_1, %c0_2] : memref<128x256xbf16, #tpu.memory_space<vmem>>, vector<128x256xbf16>
    %cst = arith.constant dense<0.000000e+00> : vector<8x256xf32>
    %2 = tpu.matmul %0, %1, %cst {dimension_numbers = #tpu.dot_dimension_numbers<[1], [0], [0], [1], [0, 0, 1, 1], [], []>} : vector<8x128xbf16>, vector<128x256xbf16>, vector<8x256xf32> -> vector<8x256xf32>
    %c0_3 = arith.constant 0 : index
    %c0_4 = arith.constant 0 : index
    %3 = vector.load %arg3[%c0_3, %c0_4] : memref<1x256xf32, #tpu.memory_space<vmem>>, vector<1x256xf32>
    %4 = vector.broadcast %3 : vector<1x256xf32> to vector<8x256xf32>
    %5 = arith.addf %2, %4 : vector<8x256xf32>
    %6 = vector.extract_strided_slice %5 {offsets = [0, 0], sizes = [8, 128], strides = [1, 1]} : vector<8x256xf32> to vector<8x128xf32>
    %7 = vector.extract_strided_slice %5 {offsets = [0, 128], sizes = [8, 128], strides = [1, 1]} : vector<8x256xf32> to vector<8x128xf32>
    %cst_5 = arith.constant 0.000000e+00 : f32
    %8 = vector.broadcast %cst_5 : f32 to vector<8x128xf32>
    %9 = arith.subf %8, %6 : vector<8x128xf32>
    %10 = math.exp %9 : vector<8x128xf32>
    %cst_6 = arith.constant 1.000000e+00 : f32
    %11 = vector.broadcast %cst_6 : f32 to vector<8x128xf32>
    %12 = arith.addf %11, %10 : vector<8x128xf32>
    %13 = tpu.reciprocal %12 {approx = true} : vector<8x128xf32> -> vector<8x128xf32>
    %c0_7 = arith.constant 0 : index
    %c0_8 = arith.constant 0 : index
    %14 = vector.load %arg6[%c0_7, %c0_8] : memref<1x128xf32, #tpu.memory_space<vmem>>, vector<1x128xf32>
    %cst_9 = arith.constant 0.000000e+00 : f32
    %15 = vector.broadcast %cst_9 : f32 to vector<1x128xf32>
    %16 = arith.cmpf ogt, %14, %15 : vector<1x128xf32>
    %cst_10 = arith.constant -1.000000e+30 : f32
    %17 = vector.shape_cast %16 : vector<1x128xi1> to vector<1x128xi1>
    %18 = vector.broadcast %17 : vector<1x128xi1> to vector<8x128xi1>
    %19 = vector.broadcast %cst_10 : f32 to vector<8x128xf32>
    %20 = arith.select %18, %7, %19 : vector<8x128xi1>, vector<8x128xf32>
    %cst_11 = arith.constant dense<0xFF800000> : vector<8xf32>
    %21 = vector.multi_reduction <maximumf>, %20, %cst_11 [1] : vector<8x128xf32> to vector<8xf32>
    %22 = vector.shape_cast %21 : vector<8xf32> to vector<8x1xf32>
    %23 = vector.broadcast %22 : vector<8x1xf32> to vector<8x128xf32>
    %24 = arith.subf %7, %23 : vector<8x128xf32>
    %25 = math.exp %24 : vector<8x128xf32>
    %26 = vector.broadcast %14 : vector<1x128xf32> to vector<8x128xf32>
    %27 = arith.mulf %25, %26 : vector<8x128xf32>
    %28 = arith.truncf %27 : vector<8x128xf32> to vector<8x128xbf16>
    %c0_12 = arith.constant 0 : index
    %c0_13 = arith.constant 0 : index
    %29 = vector.load %arg5[%c0_12, %c0_13] : memref<128x128xbf16, #tpu.memory_space<vmem>>, vector<128x128xbf16>
    %cst_14 = arith.constant dense<0.000000e+00> : vector<8x128xf32>
    %30 = tpu.matmul %28, %29, %cst_14 {dimension_numbers = #tpu.dot_dimension_numbers<[1], [0], [0], [1], [0, 0, 1, 1], [], []>} : vector<8x128xbf16>, vector<128x128xbf16>, vector<8x128xf32> -> vector<8x128xf32>
    %31 = arith.truncf %30 : vector<8x128xf32> to vector<8x128xbf16>
    %c0_15 = arith.constant 0 : index
    %c0_16 = arith.constant 0 : index
    %32 = vector.load %arg4[%c0_15, %c0_16] : memref<128x128xbf16, #tpu.memory_space<vmem>>, vector<128x128xbf16>
    %cst_17 = arith.constant dense<0.000000e+00> : vector<8x128xf32>
    %33 = tpu.matmul %31, %32, %cst_17 {dimension_numbers = #tpu.dot_dimension_numbers<[1], [0], [0], [1], [0, 0, 1, 1], [], []>} : vector<8x128xbf16>, vector<128x128xbf16>, vector<8x128xf32> -> vector<8x128xf32>
    %cst_18 = arith.constant 1.000000e+00 : f32
    %34 = vector.broadcast %cst_18 : f32 to vector<1x128xf32>
    %35 = arith.subf %34, %14 : vector<1x128xf32>
    %36 = vector.broadcast %35 : vector<1x128xf32> to vector<8x128xf32>
    %37 = arith.addf %33, %36 : vector<8x128xf32>
    %38 = tpu.reciprocal %37 {approx = true} : vector<8x128xf32> -> vector<8x128xf32>
    %39 = arith.mulf %27, %38 : vector<8x128xf32>
    %40 = arith.truncf %13 : vector<8x128xf32> to vector<8x128xbf16>
    %c0_19 = arith.constant 0 : index
    %c0_20 = arith.constant 0 : index
    %41 = vector.load %arg7[%c0_19, %c0_20] : memref<128x128xbf16, #tpu.memory_space<vmem>>, vector<128x128xbf16>
    %cst_21 = arith.constant dense<0.000000e+00> : vector<8x128xf32>
    %42 = tpu.matmul %40, %41, %cst_21 {dimension_numbers = #tpu.dot_dimension_numbers<[1], [0], [0], [1], [0, 0, 1, 1], [], []>} : vector<8x128xbf16>, vector<128x128xbf16>, vector<8x128xf32> -> vector<8x128xf32>
    %43 = arith.truncf %39 : vector<8x128xf32> to vector<8x128xbf16>
    %c0_22 = arith.constant 0 : index
    %c0_23 = arith.constant 0 : index
    %44 = vector.load %arg8[%c0_22, %c0_23] : memref<128x128xbf16, #tpu.memory_space<vmem>>, vector<128x128xbf16>
    %cst_24 = arith.constant dense<0.000000e+00> : vector<8x128xf32>
    %45 = tpu.matmul %43, %44, %cst_24 {dimension_numbers = #tpu.dot_dimension_numbers<[1], [0], [0], [1], [0, 0, 1, 1], [], []>} : vector<8x128xbf16>, vector<128x128xbf16>, vector<8x128xf32> -> vector<8x128xf32>
    %c0_25 = arith.constant 0 : index
    %c0_26 = arith.constant 0 : index
    %46 = vector.load %arg9[%c0_25, %c0_26] : memref<1x128xf32, #tpu.memory_space<vmem>>, vector<1x128xf32>
    %47 = vector.broadcast %46 : vector<1x128xf32> to vector<8x128xf32>
    %48 = arith.addf %45, %47 : vector<8x128xf32>
    %49 = arith.mulf %42, %48 : vector<8x128xf32>
    %c0_27 = arith.constant 0 : index
    %c0_28 = arith.constant 0 : index
    %50 = vector.load %arg10[%c0_27, %c0_28] : memref<8x384xf32, #tpu.memory_space<vmem>>, vector<8x128xf32>
    tpu.vector_store %arg10[%c0_27, %c0_28], %13 {strides = array<i32>} : memref<8x384xf32, #tpu.memory_space<vmem>>, vector<8x128xf32>,
    %c0_29 = arith.constant 0 : index
    %c128 = arith.constant 128 : index
    %51 = vector.load %arg10[%c0_29, %c128] : memref<8x384xf32, #tpu.memory_space<vmem>>, vector<8x128xf32>
    tpu.vector_store %arg10[%c0_29, %c128], %39 {strides = array<i32>} : memref<8x384xf32, #tpu.memory_space<vmem>>, vector<8x128xf32>,
    %c0_30 = arith.constant 0 : index
    %c256 = arith.constant 256 : index
    %52 = vector.load %arg10[%c0_30, %c256] : memref<8x384xf32, #tpu.memory_space<vmem>>, vector<8x128xf32>
    tpu.vector_store %arg10[%c0_30, %c256], %49 {strides = array<i32>} : memref<8x384xf32, #tpu.memory_space<vmem>>, vector<8x128xf32>,
    return
  }
  func.func @transform_0(%arg0: i32) -> (i32, i32) {
    %c0_i32 = arith.constant 0 : i32
    %c0_i32_0 = arith.constant 0 : i32
    return %arg0, %c0_i32 : i32, i32
  }
  func.func @transform_1(%arg0: i32) -> (i32, i32) {
    %c0_i32 = arith.constant 0 : i32
    %c0_i32_0 = arith.constant 0 : i32
    %c0_i32_1 = arith.constant 0 : i32
    return %c0_i32, %c0_i32_0 : i32, i32
  }
  func.func @transform_2(%arg0: i32) -> (i32, i32) {
    %c0_i32 = arith.constant 0 : i32
    %c0_i32_0 = arith.constant 0 : i32
    %c0_i32_1 = arith.constant 0 : i32
    return %c0_i32, %c0_i32_0 : i32, i32
  }
  func.func @transform_3(%arg0: i32) -> (i32, i32) {
    %c0_i32 = arith.constant 0 : i32
    %c0_i32_0 = arith.constant 0 : i32
    %c0_i32_1 = arith.constant 0 : i32
    return %c0_i32, %c0_i32_0 : i32, i32
  }
  func.func @transform_4(%arg0: i32) -> (i32, i32) {
    %c0_i32 = arith.constant 0 : i32
    %c0_i32_0 = arith.constant 0 : i32
    %c0_i32_1 = arith.constant 0 : i32
    return %c0_i32, %c0_i32_0 : i32, i32
  }
  func.func @transform_5(%arg0: i32) -> (i32, i32) {
    %c0_i32 = arith.constant 0 : i32
    %c0_i32_0 = arith.constant 0 : i32
    %c0_i32_1 = arith.constant 0 : i32
    return %c0_i32, %c0_i32_0 : i32, i32
  }
  func.func @transform_6(%arg0: i32) -> (i32, i32) {
    %c0_i32 = arith.constant 0 : i32
    %c0_i32_0 = arith.constant 0 : i32
    %c0_i32_1 = arith.constant 0 : i32
    return %c0_i32, %c0_i32_0 : i32, i32
  }
  func.func @transform_7(%arg0: i32) -> (i32, i32) {
    %c0_i32 = arith.constant 0 : i32
    %c0_i32_0 = arith.constant 0 : i32
    %c0_i32_1 = arith.constant 0 : i32
    return %c0_i32, %c0_i32_0 : i32, i32
  }
  func.func @transform_8(%arg0: i32) -> (i32, i32) {
    %c0_i32 = arith.constant 0 : i32
    %c0_i32_0 = arith.constant 0 : i32
    %c0_i32_1 = arith.constant 0 : i32
    return %c0_i32, %c0_i32_0 : i32, i32
  }
  func.func @transform_9(%arg0: i32) -> (i32, i32) {
    %c0_i32 = arith.constant 0 : i32
    %c0_i32_0 = arith.constant 0 : i32
    return %arg0, %c0_i32 : i32, i32
  }
}

module attributes {stable_mosaic.version = 11 : i64} {
  func.func @kernel(%arg0: i32, %arg1: memref<8x128xbf16, #tpu.memory_space<vmem>>, %arg2: memref<128x256xbf16, #tpu.memory_space<vmem>>, %arg3: memref<1x256xf32, #tpu.memory_space<vmem>>, %arg4: memref<128x128xbf16, #tpu.memory_space<vmem>>, %arg5: memref<128x128xbf16, #tpu.memory_space<vmem>>, %arg6: memref<1x128xf32, #tpu.memory_space<vmem>>, %arg7: memref<128x128xbf16, #tpu.memory_space<vmem>>, %arg8: memref<128x128xbf16, #tpu.memory_space<vmem>>, %arg9: memref<1x128xf32, #tpu.memory_space<vmem>>, %arg10: memref<8x384xf32, #tpu.memory_space<vmem>>) attributes {dimension_semantics = [#tpu.dimension_semantics<parallel>], iteration_bounds = array<i64: 1>, scalar_prefetch = 0 : i64, scratch_operands = 0 : i64, tpu.core_type = #tpu.core_type<tc>, window_params = [{transform_indices = @transform_0, window_bounds = array<i64: 8, 128>}, {pipeline_mode = #tpu.pipeline_mode<synchronous>, transform_indices = @transform_1, window_bounds = array<i64: 128, 256>}, {pipeline_mode = #tpu.pipeline_mode<synchronous>, transform_indices = @transform_2, window_bounds = array<i64: 1, 256>}, {pipeline_mode = #tpu.pipeline_mode<synchronous>, transform_indices = @transform_3, window_bounds = array<i64: 128, 128>}, {pipeline_mode = #tpu.pipeline_mode<synchronous>, transform_indices = @transform_4, window_bounds = array<i64: 128, 128>}, {pipeline_mode = #tpu.pipeline_mode<synchronous>, transform_indices = @transform_5, window_bounds = array<i64: 1, 128>}, {pipeline_mode = #tpu.pipeline_mode<synchronous>, transform_indices = @transform_6, window_bounds = array<i64: 128, 128>}, {pipeline_mode = #tpu.pipeline_mode<synchronous>, transform_indices = @transform_7, window_bounds = array<i64: 128, 128>}, {pipeline_mode = #tpu.pipeline_mode<synchronous>, transform_indices = @transform_8, window_bounds = array<i64: 1, 128>}, {transform_indices = @transform_9, window_bounds = array<i64: 8, 384>}]} {
    %c0 = arith.constant 0 : index
    %c0_0 = arith.constant 0 : index
    %0 = vector.load %arg1[%c0, %c0_0] : memref<8x128xbf16, #tpu.memory_space<vmem>>, vector<8x128xbf16>
    %c0_1 = arith.constant 0 : index
    %c0_2 = arith.constant 0 : index
    %1 = vector.load %arg2[%c0_1, %c0_2] : memref<128x256xbf16, #tpu.memory_space<vmem>>, vector<128x256xbf16>
    %cst = arith.constant dense<0.000000e+00> : vector<8x256xf32>
    %2 = tpu.matmul %0, %1, %cst {dimension_numbers = #tpu.dot_dimension_numbers<[1], [0], [0], [1], [0, 0, 1, 1], [], []>} : vector<8x128xbf16>, vector<128x256xbf16>, vector<8x256xf32> -> vector<8x256xf32>
    %c0_3 = arith.constant 0 : index
    %c0_4 = arith.constant 0 : index
    %3 = vector.load %arg3[%c0_3, %c0_4] : memref<1x256xf32, #tpu.memory_space<vmem>>, vector<1x256xf32>
    %4 = vector.broadcast %3 : vector<1x256xf32> to vector<8x256xf32>
    %5 = arith.addf %2, %4 : vector<8x256xf32>
    %6 = vector.extract_strided_slice %5 {offsets = [0, 0], sizes = [8, 128], strides = [1, 1]} : vector<8x256xf32> to vector<8x128xf32>
    %7 = vector.extract_strided_slice %5 {offsets = [0, 128], sizes = [8, 128], strides = [1, 1]} : vector<8x256xf32> to vector<8x128xf32>
    %cst_5 = arith.constant 0.000000e+00 : f32
    %8 = vector.broadcast %cst_5 : f32 to vector<8x128xf32>
    %9 = arith.subf %8, %6 : vector<8x128xf32>
    %10 = math.exp %9 : vector<8x128xf32>
    %cst_6 = arith.constant 1.000000e+00 : f32
    %11 = vector.broadcast %cst_6 : f32 to vector<8x128xf32>
    %12 = arith.addf %11, %10 : vector<8x128xf32>
    %13 = tpu.reciprocal %12 {approx = true} : vector<8x128xf32> -> vector<8x128xf32>
    %c0_7 = arith.constant 0 : index
    %c0_8 = arith.constant 0 : index
    %14 = vector.load %arg6[%c0_7, %c0_8] : memref<1x128xf32, #tpu.memory_space<vmem>>, vector<1x128xf32>
    %cst_9 = arith.constant 0.000000e+00 : f32
    %15 = vector.broadcast %cst_9 : f32 to vector<1x128xf32>
    %16 = arith.cmpf ogt, %14, %15 : vector<1x128xf32>
    %cst_10 = arith.constant -1.000000e+30 : f32
    %17 = vector.shape_cast %16 : vector<1x128xi1> to vector<1x128xi1>
    %18 = vector.broadcast %17 : vector<1x128xi1> to vector<8x128xi1>
    %19 = vector.broadcast %cst_10 : f32 to vector<8x128xf32>
    %20 = arith.select %18, %7, %19 : vector<8x128xi1>, vector<8x128xf32>
    %cst_11 = arith.constant dense<0xFF800000> : vector<8xf32>
    %21 = vector.multi_reduction <maximumf>, %20, %cst_11 [1] : vector<8x128xf32> to vector<8xf32>
    %22 = vector.shape_cast %21 : vector<8xf32> to vector<8x1xf32>
    %23 = vector.broadcast %22 : vector<8x1xf32> to vector<8x128xf32>
    %24 = arith.subf %7, %23 : vector<8x128xf32>
    %25 = math.exp %24 : vector<8x128xf32>
    %26 = vector.broadcast %14 : vector<1x128xf32> to vector<8x128xf32>
    %27 = arith.mulf %25, %26 : vector<8x128xf32>
    %28 = arith.truncf %27 : vector<8x128xf32> to vector<8x128xbf16>
    %c0_12 = arith.constant 0 : index
    %c0_13 = arith.constant 0 : index
    %29 = vector.load %arg5[%c0_12, %c0_13] : memref<128x128xbf16, #tpu.memory_space<vmem>>, vector<128x128xbf16>
    %cst_14 = arith.constant dense<0.000000e+00> : vector<8x128xf32>
    %30 = tpu.matmul %28, %29, %cst_14 {dimension_numbers = #tpu.dot_dimension_numbers<[1], [0], [0], [1], [0, 0, 1, 1], [], []>} : vector<8x128xbf16>, vector<128x128xbf16>, vector<8x128xf32> -> vector<8x128xf32>
    %31 = arith.truncf %30 : vector<8x128xf32> to vector<8x128xbf16>
    %c0_15 = arith.constant 0 : index
    %c0_16 = arith.constant 0 : index
    %32 = vector.load %arg4[%c0_15, %c0_16] : memref<128x128xbf16, #tpu.memory_space<vmem>>, vector<128x128xbf16>
    %cst_17 = arith.constant dense<0.000000e+00> : vector<8x128xf32>
    %33 = tpu.matmul %31, %32, %cst_17 {dimension_numbers = #tpu.dot_dimension_numbers<[1], [0], [0], [1], [0, 0, 1, 1], [], []>} : vector<8x128xbf16>, vector<128x128xbf16>, vector<8x128xf32> -> vector<8x128xf32>
    %cst_18 = arith.constant 1.000000e+00 : f32
    %34 = vector.broadcast %cst_18 : f32 to vector<1x128xf32>
    %35 = arith.subf %34, %14 : vector<1x128xf32>
    %36 = vector.broadcast %35 : vector<1x128xf32> to vector<8x128xf32>
    %37 = arith.addf %33, %36 : vector<8x128xf32>
    %38 = tpu.reciprocal %37 {approx = true} : vector<8x128xf32> -> vector<8x128xf32>
    %39 = arith.mulf %27, %38 : vector<8x128xf32>
    %40 = arith.truncf %13 : vector<8x128xf32> to vector<8x128xbf16>
    %c0_19 = arith.constant 0 : index
    %c0_20 = arith.constant 0 : index
    %41 = vector.load %arg7[%c0_19, %c0_20] : memref<128x128xbf16, #tpu.memory_space<vmem>>, vector<128x128xbf16>
    %cst_21 = arith.constant dense<0.000000e+00> : vector<8x128xf32>
    %42 = tpu.matmul %40, %41, %cst_21 {dimension_numbers = #tpu.dot_dimension_numbers<[1], [0], [0], [1], [0, 0, 1, 1], [], []>} : vector<8x128xbf16>, vector<128x128xbf16>, vector<8x128xf32> -> vector<8x128xf32>
    %43 = arith.truncf %39 : vector<8x128xf32> to vector<8x128xbf16>
    %c0_22 = arith.constant 0 : index
    %c0_23 = arith.constant 0 : index
    %44 = vector.load %arg8[%c0_22, %c0_23] : memref<128x128xbf16, #tpu.memory_space<vmem>>, vector<128x128xbf16>
    %cst_24 = arith.constant dense<0.000000e+00> : vector<8x128xf32>
    %45 = tpu.matmul %43, %44, %cst_24 {dimension_numbers = #tpu.dot_dimension_numbers<[1], [0], [0], [1], [0, 0, 1, 1], [], []>} : vector<8x128xbf16>, vector<128x128xbf16>, vector<8x128xf32> -> vector<8x128xf32>
    %c0_25 = arith.constant 0 : index
    %c0_26 = arith.constant 0 : index
    %46 = vector.load %arg9[%c0_25, %c0_26] : memref<1x128xf32, #tpu.memory_space<vmem>>, vector<1x128xf32>
    %47 = vector.broadcast %46 : vector<1x128xf32> to vector<8x128xf32>
    %48 = arith.addf %45, %47 : vector<8x128xf32>
    %49 = arith.mulf %42, %48 : vector<8x128xf32>
    %c0_27 = arith.constant 0 : index
    %c0_28 = arith.constant 0 : index
    %50 = vector.load %arg10[%c0_27, %c0_28] : memref<8x384xf32, #tpu.memory_space<vmem>>, vector<8x128xf32>
    tpu.vector_store %arg10[%c0_27, %c0_28], %13 {strides = array<i32>} : memref<8x384xf32, #tpu.memory_space<vmem>>, vector<8x128xf32>,
    %c0_29 = arith.constant 0 : index
    %c128 = arith.constant 128 : index
    %51 = vector.load %arg10[%c0_29, %c128] : memref<8x384xf32, #tpu.memory_space<vmem>>, vector<8x128xf32>
    tpu.vector_store %arg10[%c0_29, %c128], %39 {strides = array<i32>} : memref<8x384xf32, #tpu.memory_space<vmem>>, vector<8x128xf32>,
    %c0_30 = arith.constant 0 : index
    %c256 = arith.constant 256 : index
    %52 = vector.load %arg10[%c0_30, %c256] : memref<8x384xf32, #tpu.memory_space<vmem>>, vector<8x128xf32>
    tpu.vector_store %arg10[%c0_30, %c256], %49 {strides = array<i32>} : memref<8x384xf32, #tpu.memory_space<vmem>>, vector<8x128xf32>,
    return
  }
  func.func @transform_0(%arg0: i32) -> (i32, i32) {
    %c0_i32 = arith.constant 0 : i32
    %c0_i32_0 = arith.constant 0 : i32
    return %arg0, %c0_i32 : i32, i32
  }
  func.func @transform_1(%arg0: i32) -> (i32, i32) {
    %c0_i32 = arith.constant 0 : i32
    %c0_i32_0 = arith.constant 0 : i32
    %c0_i32_1 = arith.constant 0 : i32
    return %c0_i32, %c0_i32_0 : i32, i32
  }
  func.func @transform_2(%arg0: i32) -> (i32, i32) {
    %c0_i32 = arith.constant 0 : i32
    %c0_i32_0 = arith.constant 0 : i32
    %c0_i32_1 = arith.constant 0 : i32
    return %c0_i32, %c0_i32_0 : i32, i32
  }
  func.func @transform_3(%arg0: i32) -> (i32, i32) {
    %c0_i32 = arith.constant 0 : i32
    %c0_i32_0 = arith.constant 0 : i32
    %c0_i32_1 = arith.constant 0 : i32
    return %c0_i32, %c0_i32_0 : i32, i32
  }
  func.func @transform_4(%arg0: i32) -> (i32, i32) {
    %c0_i32 = arith.constant 0 : i32
    %c0_i32_0 = arith.constant 0 : i32
    %c0_i32_1 = arith.constant 0 : i32
    return %c0_i32, %c0_i32_0 : i32, i32
  }
  func.func @transform_5(%arg0: i32) -> (i32, i32) {
    %c0_i32 = arith.constant 0 : i32
    %c0_i32_0 = arith.constant 0 : i32
    %c0_i32_1 = arith.constant 0 : i32
    return %c0_i32, %c0_i32_0 : i32, i32
  }
  func.func @transform_6(%arg0: i32) -> (i32, i32) {
    %c0_i32 = arith.constant 0 : i32
    %c0_i32_0 = arith.constant 0 : i32
    %c0_i32_1 = arith.constant 0 : i32
    return %c0_i32, %c0_i32_0 : i32, i32
  }
  func.func @transform_7(%arg0: i32) -> (i32, i32) {
    %c0_i32 = arith.constant 0 : i32
    %c0_i32_0 = arith.constant 0 : i32
    %c0_i32_1 = arith.constant 0 : i32
    return %c0_i32, %c0_i32_0 : i32, i32
  }
  func.func @transform_8(%arg0: i32) -> (i32, i32) {
    %c0_i32 = arith.constant 0 : i32
    %c0_i32_0 = arith.constant 0 : i32
    %c0_i32_1 = arith.constant 0 : i32
    return %c0_i32, %c0_i32_0 : i32, i32
  }
  func.func @transform_9(%arg0: i32) -> (i32, i32) {
    %c0_i32 = arith.constant 0 : i32
    %c0_i32_0 = arith.constant 0 : i32
    return %arg0, %c0_i32 : i32, i32
  }
}

</mosaic_0001>

<bundles_post_ra>
// kernel: tpu_custom_call.1
= control target key start
LH: loop header
LB: loop body
LE: loop exit
PB: predicated region body
PF: predicated region fallthrough
CT: control target
= control target key end

     0   :  { %14 = vsyncpa [#allocation3], 0  ;;  %s1303_s0 = inlined_call_operand.hbm [shape: bf16[8,128], index: 0, kind: input, shape index: {}]   ;;  %s1304_s1 = inlined_call_operand.hbm [shape: bf16[128,256], index: 1, kind: input, shape index: {}]   ;;  %s1305_s2 = inlined_call_operand.vmem [shape: f32[1,256], index: 2, kind: input, shape index: {}]   ;;  %s1306_s3 = inlined_call_operand.hbm [shape: bf16[128,128], index: 3, kind: input, shape index: {}]   ;;  %s1307_s4 = inlined_call_operand.hbm [shape: bf16[128,128], index: 4, kind: input, shape index: {}]   ;;  %s1308_s5 = inlined_call_operand.vmem [shape: f32[1,128], index: 5, kind: input, shape index: {}]   ;;  %s1309_s6 = inlined_call_operand.hbm [shape: bf16[128,128], index: 6, kind: input, shape index: {}]   ;;  %s1310_s7 = inlined_call_operand.hbm [shape: bf16[128,128], index: 7, kind: input, shape index: {}]   ;;  %s1311_s8 = inlined_call_operand.vmem [shape: f32[1,128], index: 8, kind: input, shape index: {}]   ;;  %s1312_s9 = inlined_call_operand.hbm [shape: f32[8,384], index: 9, kind: output, shape index: {}]  }
   0x1   :  { %15 = vsyncpa [#allocation6], 0 }
   0x2   :  { %16 = vsyncpa [#allocation9], 0 }
   0x3   :  { %17 = vsyncpa [#allocation12], 0 }
   0x4   :  { %18 = vsyncpa [#allocation4], 0  ;;  %s1141_s30 = smov [#allocation5]  }
   0x5   :  { %s34_s10 = sshll.u32 %s1141_s30, 4  ;;  %s35_s10 = int_to_ptr.vmem [resolvable:$true] %s34_s10 }
   0x6   :  { %s999_s11 = scalar_lea.vmem %s35_s10, 2048  ;;  %p1004_p1 = scmp.lt.s32.totalorder %s35_s10, %s35_s10 }
   0x7   :  { %p1000_p0 = scmp.ne.s32.totalorder %s35_s10, %s999_s11  ;;  %p1005_p2 = scmp.lt.s32.totalorder %s999_s11, %s999_s11 }
   0x9   :  { %p1006_p3 = por %p1005_p2, %p1004_p1 }
   0xb   :  { %p1007_p4 = pnand %p1006_p3, %p1000_p0 }
   0xd   :  { %1010 = shalt.err (!%p1007_p4)
}
   0xe   :  { %s1142_s12 = smov 128   ;;  %s1143_s13 = smov 8  }
   0xf   :  { %40 = dma.hbm_to_vmem [thread:$0]  %s1304_s1, 2048, %s35_s10, [#allocation6], %s1142_s12, %s1142_s12, %s1143_s13  }
  0x10   :  { %s1144_s16 = smov [#allocation8]   ;;  %s1145_s18 = smov [#allocation2]  }
  0x11   :  { %s60_s17 = sshll.u32 %s1144_s16, 4  ;;  %s25_s19 = sshll.u32 %s1145_s18, 4  ;;  %s61_s17 = int_to_ptr.vmem [resolvable:$true] %s60_s17  ;;  %s26_s19 = int_to_ptr.vmem [resolvable:$true] %s25_s19 }
  0x12   :  { %s1019_s20 = scalar_lea.vmem %s61_s17, 1024  ;;  %p1024_p6 = scmp.lt.s32.totalorder %s61_s17, %s61_s17 }
  0x13   :  { %p1020_p5 = scmp.ne.s32.totalorder %s61_s17, %s1019_s20  ;;  %p1025_p7 = scmp.lt.s32.totalorder %s1019_s20, %s1019_s20 }
  0x15   :  { %p1026_p8 = por %p1025_p7, %p1024_p6 }
  0x17   :  { %p1027_p9 = pnand %p1026_p8, %p1020_p5 }
  0x19   :  { %1030 = shalt.err (!%p1027_p9)
}
  0x1a   :  { %s1146_s21 = smov 64   ;;  %s1147_s22 = smov 4  }
  0x1b   :  { %66 = dma.hbm_to_vmem [thread:$0]  %s1307_s4, 1024, %s61_s17, [#allocation9], %s1146_s21, %s1146_s21, %s1147_s22  }
  0x1c   :  { %s1039_s1 = scalar_lea.vmem %s26_s19, 64  ;;  %p1044_p11 = scmp.lt.s32.totalorder %s26_s19, %s26_s19 }
  0x1d   :  { %p1040_p10 = scmp.ne.s32.totalorder %s26_s19, %s1039_s1  ;;  %p1045_p12 = scmp.lt.s32.totalorder %s1039_s1, %s1039_s1 }
  0x1f   :  { %p1046_p13 = por %p1045_p12, %p1044_p11 }
  0x21   :  { %p1047_p0 = pnand %p1046_p13, %p1040_p10 }
  0x23   :  { %1050 = shalt.err (!%p1047_p0)
}
  0x24   :  { %28 = dma.hbm_to_vmem [thread:$0]  %s1303_s0, 64, %s26_s19, [#allocation3]  }
  0x25   :  { %s1148_s27 = smov [#allocation7]   ;;  %s1149_s29 = smov [#allocation10]  }
  0x26   :  { %s48_s28 = sshll.u32 %s1148_s27, 4  ;;  %s74_s30 = sshll.u32 %s1149_s29, 4  ;;  %s49_s28 = int_to_ptr.vmem [resolvable:$true] %s48_s28  ;;  %s75_s30 = int_to_ptr.vmem [resolvable:$true] %s74_s30 }
  0x27   :  { %s1059_s10 = scalar_lea.vmem %s49_s28, 1024  ;;  %p1064_p2 = scmp.lt.s32.totalorder %s49_s28, %s49_s28 }
  0x28   :  { %p1060_p1 = scmp.ne.s32.totalorder %s49_s28, %s1059_s10  ;;  %p1065_p3 = scmp.lt.s32.totalorder %s1059_s10, %s1059_s10 }
  0x2a   :  { %p1066_p4 = por %p1065_p3, %p1064_p2 }
  0x2c   :  { %p1067_p5 = pnand %p1066_p4, %p1060_p1 }
  0x2e   :  { %1070 = shalt.err (!%p1067_p5)
}
  0x2f   :  { %54 = dma.hbm_to_vmem [thread:$0]  %s1306_s3, 1024, %s49_s28, [#allocation6], %s1146_s21, %s1146_s21, %s1147_s22  }
  0x30   :  { %s1079_s0 = scalar_lea.vmem %s75_s30, 1024  ;;  %p1084_p7 = scmp.lt.s32.totalorder %s75_s30, %s75_s30 }
  0x31   :  { %p1080_p6 = scmp.ne.s32.totalorder %s75_s30, %s1079_s0  ;;  %p1085_p8 = scmp.lt.s32.totalorder %s1079_s0, %s1079_s0 }
  0x33   :  { %p1086_p9 = por %p1085_p8, %p1084_p7 }
  0x35   :  { %p1087_p10 = pnand %p1086_p9, %p1080_p6 }
  0x37   :  { %1090 = shalt.err (!%p1087_p10)
}
  0x38   :  { %80 = dma.hbm_to_vmem [thread:$0]  %s1309_s6, 1024, %s75_s30, [#allocation9], %s1146_s21, %s1146_s21, %s1147_s22  }
  0x39   :  { %s1150_s14 = smov [#allocation11]  }
  0x3a   :  { %s86_s15 = sshll.u32 %s1150_s14, 4  ;;  %s87_s15 = int_to_ptr.vmem [resolvable:$true] %s86_s15 }
  0x3b   :  { %s1099_s16 = scalar_lea.vmem %s87_s15, 1024  ;;  %p1104_p12 = scmp.lt.s32.totalorder %s87_s15, %s87_s15 }
  0x3c   :  { %p1100_p11 = scmp.ne.s32.totalorder %s87_s15, %s1099_s16  ;;  %p1105_p13 = scmp.lt.s32.totalorder %s1099_s16, %s1099_s16 }
  0x3e   :  { %p1106_p0 = por %p1105_p13, %p1104_p12 }
  0x40   :  { %p1107_p1 = pnand %p1106_p0, %p1100_p11 }
  0x42   :  { %1110 = shalt.err (!%p1107_p1)
}
  0x43   :  { %92 = dma.hbm_to_vmem [thread:$0]  %s1310_s7, 1024, %s87_s15, [#allocation12], %s1146_s21, %s1146_s21, %s1147_s22  }
  0x44   :  { %1131 = dma.done.wait [#allocation3], 64  }
  0x45   :  { %1132 = vsyncadd [#allocation3], 4294967232 }
  0x46   :  { %1133 = dma.done.wait [#allocation6], 3072  }
  0x47   :  { %1134 = vsyncadd [#allocation6], 4294964224 }
  0x48   :  { %1135 = dma.done.wait [#allocation9], 2048  }
  0x49   :  { %1136 = vsyncadd [#allocation9], 4294965248 }
  0x4a   :  { %1137 = dma.done.wait [#allocation12], 1024  }
  0x4b   :  { %1138 = vsyncadd [#allocation12], 4294966272  ;;  %v1151_v0 = vmov 0   ;;  %v927_v1 = vld [vmem:[#allocation5 + $0x74] ss:$8 sps:$4 sm:$0xff]   ;;  %v1152_v19 = vmov 0.0   ;;  %v133_v22 = vlaneseq }
  0x4c   :  { %255 = vmatprep.mubr.bf16.mxu0 %v1151_v0  ;;  %v929_v2 = vld [vmem:[#allocation5 + $0x70] ss:$8 sps:$4 sm:$0xff]   ;;  %223 = vmatprep.subr.bf16.mxu0 %v927_v1  ;;  %v930_v3 = vld [vmem:[#allocation5 + $0x64] ss:$8 sps:$4 sm:$0xff]   ;;  %v932_v4 = vld [vmem:[#allocation5 + $0x60] ss:$8 sps:$4 sm:$0xff]  }
  0x4d   :  { %224 = vmatpush1.bf16.msra.mxu0 %v929_v2  ;;  %v933_v5 = vld [vmem:[#allocation5 + $0x54] ss:$8 sps:$4 sm:$0xff]   ;;  %v935_v6 = vld [vmem:[#allocation5 + $0x50] ss:$8 sps:$4 sm:$0xff]   ;;  %v936_v7 = vld [vmem:[#allocation5 + $0x44] ss:$8 sps:$4 sm:$0xff]   ;;  %833 = vmatprep.subr.bf16.mxu1 %v1152_v19 }
  0x4e   :  { %225 = vmatprep.subr.bf16.mxu0 %v930_v3  ;;  %v938_v8 = vld [vmem:[#allocation5 + $0x40] ss:$8 sps:$4 sm:$0xff]   ;;  %v939_v9 = vld [vmem:[#allocation5 + $0x34] ss:$8 sps:$4 sm:$0xff]   ;;  %v941_v10 = vld [vmem:[#allocation5 + $0x30] ss:$8 sps:$4 sm:$0xff]  }
  0x4f   :  { %v942_v11 = vld [vmem:[#allocation5 + $0x24] ss:$8 sps:$4 sm:$0xff]   ;;  %v944_v12 = vld [vmem:[#allocation5 + $0x20] ss:$8 sps:$4 sm:$0xff]   ;;  %v945_v13 = vld [vmem:[#allocation5 + $0x14] ss:$8 sps:$4 sm:$0xff]  }
  0x50   :  { %v947_v14 = vld [vmem:[#allocation5 + $0x10] ss:$8 sps:$4 sm:$0xff]   ;;  %v948_v15 = vld [vmem:[#allocation5 + $0x4] ss:$8 sps:$4 sm:$0xff]   ;;  %v950_v16 = vld [vmem:[#allocation5] ss:$8 sps:$4 sm:$0xff]  }
  0x51   :  { %226 = vmatpush1.bf16.msra.mxu0 %v932_v4  ;;  %v114_v17 = vld [vmem:[#allocation2] sm:$0xf]  ;;  %v952_v20 = vld [vmem:[#allocation8 + $0x30] sm:$0xff]   ;;  %v953_v21 = vld [vmem:[#allocation8 + $0x28] sm:$0xff]   ;;  %v134_v24 = vshrl.u32 %v133_v22, 7  ;;  %vm1153_vm2 = vmmov 0  }
  0x52   :  { %227 = vmatprep.subr.bf16.mxu0 %v933_v5  ;;  %v951_v18 = vld [vmem:[#allocation8 + $0x38] sm:$0xff]   ;;  %v954_v41 = vld [vmem:[#allocation8 + $0x20] sm:$0xff]   ;;  %849 = vmatprep.mubr.msk.bf16.mxu1 %vm1153_vm2, %v1152_v19  ;;  %v956_v45 = vld [vmem:[#allocation8 + $0x10] sm:$0xff]   ;;  %s1154_s20 = smov [#allocation13]  }
  0x53   :  { %834 = vmatpush3.bf16.msra.mxu1 %v951_v18  ;;  %v1243_v23 = vld [vmem:[%s1308_s5] sm:$0x1]  ;;  %v1246_v25 = vsub.s32 0, %v134_v24  ;;  %v139_v28 = vsub.s32 1, %v134_v24  ;;  %v957_v46 = vld [vmem:[#allocation8 + $0x8] sm:$0xff]   ;;  %v958_v47 = vld [vmem:[#allocation8] sm:$0xff]  }
  0x54   :  { %835 = vmatprep.subr.bf16.mxu1 %v1152_v19  ;;  %vm270_vm0 = vcmp.gt.f32.partialorder %v1243_v23, 0.0  ;;  %v131_v26 = vld [vmem:[%s1305_s2] sm:$0x3]  ;;  %v968_v50 = vld [vmem:[#allocation7 + $0x30] sm:$0xff]   ;;  %v969_v51 = vld [vmem:[#allocation7 + $0x28] sm:$0xff]   ;;  %s736_s21 = sshll.u32 %s1154_s20, 4  ;;  %s737_s21 = int_to_ptr.vmem [resolvable:$true] %s736_s21 }
  0x55   :  { %228 = vmatpush1.bf16.msra.mxu0 %v935_v6  ;;  %v271_v27 = vsel %vm270_vm0, 1, %v1151_v0  ;;  %v136_v29 = vrot.slane %v131_v26, %v1246_v25  ;;  %v140_v31 = vrot.slane %v131_v26, %v139_v28  ;;  %v955_v43 = vld [vmem:[#allocation8 + $0x18] sm:$0xff]   ;;  %v970_v52 = vld [vmem:[#allocation7 + $0x20] sm:$0xff]   ;;  %v972_v54 = vld [vmem:[#allocation7 + $0x10] sm:$0xff]   ;;  %v287_v59 = vrot.slane %v1243_v23, %v1246_v25  ;;  %s1111_s22 = scalar_lea.vmem %s737_s21, 384  ;;  %p1116_p3 = scmp.lt.s32.totalorder %s737_s21, %s737_s21 }
  0x56   :  { %229 = vmatprep.subr.bf16.mxu0 %v936_v7  ;;  %v275_v30 = vrot.slane %v271_v27, %v1246_v25  ;;  %v967_v49 = vld [vmem:[#allocation7 + $0x38] sm:$0xff]   ;;  %v973_v55 = vld [vmem:[#allocation7 + $0x8] sm:$0xff]   ;;  %v960_v0 = vld [vmem:[#allocation10 + $0x30] sm:$0xff]   ;;  %p1112_p2 = scmp.ne.s32.totalorder %s737_s21, %s1111_s22  ;;  %p1117_p4 = scmp.lt.s32.totalorder %s1111_s22, %s1111_s22 }
  0x57   :  { %836 = vmatpush3.bf16.msra.mxu1 %v952_v20  ;;  %v971_v53 = vld [vmem:[#allocation7 + $0x18] sm:$0xff]   ;;  %v961_v1 = vld [vmem:[#allocation10 + $0x28] sm:$0xff]   ;;  %v962_v2 = vld [vmem:[#allocation10 + $0x20] sm:$0xff]  }
  0x58   :  { %837 = vmatprep.subr.bf16.mxu1 %v1152_v19  ;;  %vm276_vm1 = vcmp.eq.s32.totalorder %v275_v30, 1  ;;  %v959_v62 = vld [vmem:[#allocation10 + $0x38] sm:$0xff]   ;;  %v964_v4 = vld [vmem:[#allocation10 + $0x10] sm:$0xff]   ;;  %v965_v5 = vld [vmem:[#allocation10 + $0x8] sm:$0xff]   ;;  %p1118_p5 = por %p1117_p4, %p1116_p3 }
  0x59   :  { %230 = vmatpush1.bf16.msra.mxu0 %v938_v8  ;;  %v963_v3 = vld [vmem:[#allocation10 + $0x18] sm:$0xff]   ;;  %v966_v6 = vld [vmem:[#allocation10] sm:$0xff]   ;;  %v980_v26 = vld [vmem:[#allocation11 + $0x10] sm:$0xff]  }
  0x5a   :  { %231 = vmatprep.subr.bf16.mxu0 %v939_v9  ;;  %v974_v8 = vld [vmem:[#allocation7] sm:$0xff]   ;;  %v979_v24 = vld [vmem:[#allocation11 + $0x18] sm:$0xff]   ;;  %v981_v27 = vld [vmem:[#allocation11 + $0x8] sm:$0xff]   ;;  %p1119_p6 = pnand %p1118_p5, %p1112_p2 }
  0x5b   :  { %838 = vmatpush3.bf16.msra.mxu1 %v953_v21  ;;  %v978_v22 = vld [vmem:[#allocation11 + $0x20] sm:$0xff]  }
  0x5c   :  { %839 = vmatprep.subr.bf16.mxu1 %v1152_v19  ;;  %v982_v28 = vld [vmem:[#allocation11] sm:$0xff]  }
  0x5d   :  { %232 = vmatpush1.bf16.msra.mxu0 %v941_v10  ;;  %v975_v10 = vld [vmem:[#allocation11 + $0x38] sm:$0xff]  }
  0x5e   :  { %233 = vmatprep.subr.bf16.mxu0 %v942_v11 }
  0x5f   :  { %840 = vmatpush3.bf16.msra.mxu1 %v954_v41 }
  0x60   :  { %841 = vmatprep.subr.bf16.mxu1 %v1152_v19 }
  0x61   :  { %234 = vmatpush1.bf16.msra.mxu0 %v944_v12 }
  0x62   :  { %235 = vmatprep.subr.bf16.mxu0 %v945_v13 }
  0x63   :  { %842 = vmatpush3.bf16.msra.mxu1 %v955_v43 }
  0x64   :  { %843 = vmatprep.subr.bf16.mxu1 %v1152_v19 }
  0x65   :  { %236 = vmatpush1.bf16.msra.mxu0 %v947_v14  ;;  %v976_v14 = vld [vmem:[#allocation11 + $0x30] sm:$0xff]  }
  0x66   :  { %237 = vmatprep.subr.bf16.mxu0 %v948_v15 }
  0x67   :  { %844 = vmatpush3.bf16.msra.mxu1 %v956_v45 }
  0x68   :  { %845 = vmatprep.subr.bf16.mxu1 %v1152_v19 }
  0x69   :  { %238 = vmatpush1.bf16.msra.mxu0 %v950_v16  ;;  %v977_v16 = vld [vmem:[#allocation11 + $0x28] sm:$0xff]  }
  0x6a   :  { %853 = vmatprep.subr.bf16.mxu0 %v1152_v19 }
  0x6b   :  { %846 = vmatpush3.bf16.msra.mxu1 %v957_v46 }
  0x6c   :  { %256 = vmatmul.mubr.bf16.vlgmr.msra.gmra.mxu0 %v114_v17  ;;  %847 = vmatprep.subr.bf16.mxu1 %v1152_v19 }
  0x6d   :  { %869 = vmatprep.mubr.msk.bf16.mxu0 %vm1153_vm2, %v1152_v19  ;;  %854 = vmatpush3.bf16.msra.mxu0 %v967_v49 }
  0x6e   :  { %855 = vmatprep.subr.bf16.mxu0 %v1152_v19 }
  0x6f   :  { %848 = vmatpush3.bf16.msra.mxu1 %v958_v47 }
  0x70   :  { %873 = vmatprep.subr.bf16.mxu1 %v1152_v19 }
  0x71   :  { %856 = vmatpush3.bf16.msra.mxu0 %v968_v50 }
  0x72   :  { %857 = vmatprep.subr.bf16.mxu0 %v1152_v19 }
  0x75   :  { %858 = vmatpush3.bf16.msra.mxu0 %v969_v51 }
  0x76   :  { %859 = vmatprep.subr.bf16.mxu0 %v1152_v19 }
  0x79   :  { %860 = vmatpush3.bf16.msra.mxu0 %v970_v52 }
  0x7a   :  { %861 = vmatprep.subr.bf16.mxu0 %v1152_v19 }
  0x7d   :  { %862 = vmatpush3.bf16.msra.mxu0 %v971_v53 }
  0x7e   :  { %863 = vmatprep.subr.bf16.mxu0 %v1152_v19 }
  0x81   :  { %864 = vmatpush3.bf16.msra.mxu0 %v972_v54 }
  0x82   :  { %865 = vmatprep.subr.bf16.mxu0 %v1152_v19 }
  0x85   :  { %866 = vmatpush3.bf16.msra.mxu0 %v973_v55 }
  0x86   :  { %867 = vmatprep.subr.bf16.mxu0 %v1152_v19 }
  0x89   :  { %868 = vmatpush3.bf16.msra.mxu0 %v974_v8 }
  0x8a   :  { %893 = vmatprep.subr.bf16.mxu0 %v1152_v19 }
 0x12c   :  { %v257_v32 = vpop.f32.mrf.mxu0 }
 0x12d   :  { %v258_v33 = vadd.f32 %v257_v32, %v136_v29  ;;  %v412_v29 = vsub.f32 1.0, %v1243_v23 }
 0x12e   :  { %v259_v34 = vpop.f32.mrf.mxu0 }
 0x12f   :  { %v264_v35 = vsub.f32 0.0, %v258_v33  ;;  %v260_v36 = vadd.f32 %v259_v34, %v140_v31  ;;  %v417_v30 = vrot.slane %v412_v29, %v1246_v25 }
 0x130   :  { %v261_v37 = vpop.f32.mrf.mxu0 }
 0x131   :  { %v265_v38 = vmul.f32 1.442695, %v264_v35  ;;  %v277_v39 = vsel %vm276_vm1, %v260_v36, -1e+30 }
 0x132   :  { %v262_v40 = vpop.f32.mrf.mxu0  ;;  %278 = vmax.xlane.f32.xlu0 %v277_v39 }
 0x133   :  { %983 = vpow2.f32 %v265_v38 }
 0x140   :  { %v984_v42 = vpop.eup %983 }
 0x141   :  { %v267_v44 = vadd.f32 1.0, %v984_v42 }
 0x143   :  { %985 = vrcp.f32 %v267_v44 }
 0x150   :  { %v986_v48 = vpop.eup %985 }
 0x151   :  { %727 = vst [vmem:[#allocation13] sm:$0xff] %v986_v48  ;;  %v509_v7 = vpack.c.bf16 %v986_v48, %v986_v48 }
 0x1bb   :  { %v279_v56 = vpop.xlane.xlu0 %278 }
 0x1bc   :  { %v280_v57 = vsub.f32 %v260_v36, %v279_v56 }
 0x1be   :  { %v281_v58 = vmul.f32 1.442695, %v280_v57 }
 0x1c0   :  { %987 = vpow2.f32 %v281_v58 }
 0x1cd   :  { %v988_v60 = vpop.eup %987 }
 0x1ce   :  { %v1271_v61 = vmul.f32 %v988_v60, %v287_v59 }
 0x1d0   :  { %v290_v63 = vpack.c.bf16 %v1271_v61, %v1271_v61 }
 0x1d2   :  { %850 = vmatmul.mubr.bf16.vlgmr.msra.gmra.mxu1 %v290_v63 }
 0x1d3   :  { %874 = vmatpush3.bf16.msra.mxu1 %v959_v62  ;;  %889 = vmatprep.mubr.msk.bf16.mxu1 %vm1153_vm2, %v1152_v19 }
 0x1d4   :  { %875 = vmatprep.subr.bf16.mxu1 %v1152_v19 }
 0x1d7   :  { %876 = vmatpush3.bf16.msra.mxu1 %v960_v0 }
 0x1d8   :  { %877 = vmatprep.subr.bf16.mxu1 %v1152_v19 }
 0x1db   :  { %878 = vmatpush3.bf16.msra.mxu1 %v961_v1 }
 0x1dc   :  { %879 = vmatprep.subr.bf16.mxu1 %v1152_v19 }
 0x1df   :  { %880 = vmatpush3.bf16.msra.mxu1 %v962_v2 }
 0x1e0   :  { %881 = vmatprep.subr.bf16.mxu1 %v1152_v19 }
 0x1e3   :  { %882 = vmatpush3.bf16.msra.mxu1 %v963_v3 }
 0x1e4   :  { %883 = vmatprep.subr.bf16.mxu1 %v1152_v19 }
 0x1e7   :  { %884 = vmatpush3.bf16.msra.mxu1 %v964_v4 }
 0x1e8   :  { %885 = vmatprep.subr.bf16.mxu1 %v1152_v19 }
 0x1eb   :  { %886 = vmatpush3.bf16.msra.mxu1 %v965_v5 }
 0x1ec   :  { %887 = vmatprep.subr.bf16.mxu1 %v1152_v19 }
 0x1ef   :  { %888 = vmatpush3.bf16.msra.mxu1 %v966_v6 }
 0x1f2   :  { %890 = vmatmul.mubr.bf16.vlgmr.msra.gmra.mxu1 %v509_v7 }
 0x292   :  { %v389_v9 = vpop.f32.mrf.mxu1 }
 0x293   :  { %v395_v11 = vpack.c.bf16 %v389_v9, %v389_v9 }
 0x294   :  { %v851_v12 = vpop.f32.mrf.mxu1 }
 0x295   :  { %870 = vmatmul.mubr.bf16.vlgmr.msra.gmra.mxu0 %v395_v11 }
 0x296   :  { %v392_v13 = vpop.f32.mrf.mxu1  ;;  %894 = vmatpush3.bf16.msra.mxu0 %v975_v10  ;;  %909 = vmatprep.mubr.msk.bf16.mxu0 %vm1153_vm2, %v1152_v19 }
 0x297   :  { %895 = vmatprep.subr.bf16.mxu0 %v1152_v19 }
 0x298   :  { %v852_v15 = vpop.f32.mrf.mxu1 }
 0x29a   :  { %896 = vmatpush3.bf16.msra.mxu0 %v976_v14 }
 0x29b   :  { %897 = vmatprep.subr.bf16.mxu0 %v1152_v19 }
 0x29e   :  { %898 = vmatpush3.bf16.msra.mxu0 %v977_v16 }
 0x29f   :  { %899 = vmatprep.subr.bf16.mxu0 %v1152_v19 }
 0x2a2   :  { %900 = vmatpush3.bf16.msra.mxu0 %v978_v22 }
 0x2a3   :  { %901 = vmatprep.subr.bf16.mxu0 %v1152_v19 }
 0x2a6   :  { %902 = vmatpush3.bf16.msra.mxu0 %v979_v24 }
 0x2a7   :  { %903 = vmatprep.subr.bf16.mxu0 %v1152_v19 }
 0x2aa   :  { %904 = vmatpush3.bf16.msra.mxu0 %v980_v26 }
 0x2ab   :  { %905 = vmatprep.subr.bf16.mxu0 %v1152_v19 }
 0x2ae   :  { %906 = vmatpush3.bf16.msra.mxu0 %v981_v27 }
 0x2af   :  { %907 = vmatprep.subr.bf16.mxu0 %v1152_v19  ;;  %v788_v19 = vld [vmem:[%s1311_s8] ss:$0 sm:$0xff] }
 0x2b2   :  { %v608_v17 = vpop.f32.mrf.mxu1  ;;  %908 = vmatpush3.bf16.msra.mxu0 %v982_v28 }
 0x2b4   :  { %v891_v18 = vpop.f32.mrf.mxu1 }
 0x2b6   :  { %v611_v20 = vpop.f32.mrf.mxu1 }
 0x2b8   :  { %v892_v21 = vpop.f32.mrf.mxu1 }
 0x355   :  { %v501_v31 = vpop.f32.mrf.mxu0 }
 0x356   :  { %v502_v32 = vadd.f32 %v501_v31, %v417_v30 }
 0x357   :  { %v871_v33 = vpop.f32.mrf.mxu0 }
 0x358   :  { %989 = vrcp.f32 %v502_v32 }
 0x359   :  { %v504_v34 = vpop.f32.mrf.mxu0 }
 0x35b   :  { %v872_v35 = vpop.f32.mrf.mxu0 }
 0x365   :  { %v990_v36 = vpop.eup %989 }
 0x366   :  { %v508_v37 = vmul.f32 %v990_v36, %v1271_v61 }
 0x368   :  { %v614_v38 = vpack.c.bf16 %v508_v37, %v508_v37  ;;  %728 = vst [vmem:[#allocation13 + $0x8] sm:$0xff] %v508_v37 }
 0x36a   :  { %910 = vmatmul.mubr.bf16.vlgmr.msra.gmra.mxu0 %v614_v38 }
 0x42a   :  { %v720_v39 = vpop.f32.mrf.mxu0 }
 0x42b   :  { %v721_v23 = vadd.f32 %v788_v19, %v720_v39 }
 0x42c   :  { %v911_v25 = vpop.f32.mrf.mxu0 }
 0x42d   :  { %v726_v40 = vmul.f32 %v721_v23, %v608_v17 }
 0x42e   :  { %v723_v41 = vpop.f32.mrf.mxu0 }
 0x42f   :  { %729 = vst [vmem:[#allocation13 + $0x10] sm:$0xff] %v726_v40 }
 0x430   :  { %v912_v42 = vpop.f32.mrf.mxu0 }
 0x431   :  { %1122 = shalt.err (!%p1119_p6)
}
 0x432   :  { %739 = dma.vmem_to_hbm [thread:$0]  %s737_s21, 384, %s1312_s9, [#allocation4]  }
 0x433   :  { %1139 = dma.done.wait [#allocation4], 384  }
 0x434   :  { %1140 = vsyncadd [#allocation4], 4294966912 }
 0x435   :  { %743 = vsyncpa [#allocation3], 1 }
 0x436   :  { %744 = vsyncpa [#allocation6], 1 }
 0x437   :  { %745 = vsyncpa [#allocation9], 1 }
 0x438   :  { %746 = vsyncpa [#allocation12], 1 }
 0x439   :  { %747 = vsyncpa [#allocation4], 1 }

// kernel: tpu_custom_call.1
= control target key start
LH: loop header
LB: loop body
LE: loop exit
PB: predicated region body
PF: predicated region fallthrough
CT: control target
= control target key end

     0   :  { %14 = vsyncpa [#allocation3], 0  ;;  %s1303_s0 = inlined_call_operand.hbm [shape: bf16[8,128], index: 0, kind: input, shape index: {}]   ;;  %s1304_s1 = inlined_call_operand.hbm [shape: bf16[128,256], index: 1, kind: input, shape index: {}]   ;;  %s1305_s2 = inlined_call_operand.vmem [shape: f32[1,256], index: 2, kind: input, shape index: {}]   ;;  %s1306_s3 = inlined_call_operand.hbm [shape: bf16[128,128], index: 3, kind: input, shape index: {}]   ;;  %s1307_s4 = inlined_call_operand.hbm [shape: bf16[128,128], index: 4, kind: input, shape index: {}]   ;;  %s1308_s5 = inlined_call_operand.vmem [shape: f32[1,128], index: 5, kind: input, shape index: {}]   ;;  %s1309_s6 = inlined_call_operand.hbm [shape: bf16[128,128], index: 6, kind: input, shape index: {}]   ;;  %s1310_s7 = inlined_call_operand.hbm [shape: bf16[128,128], index: 7, kind: input, shape index: {}]   ;;  %s1311_s8 = inlined_call_operand.vmem [shape: f32[1,128], index: 8, kind: input, shape index: {}]   ;;  %s1312_s9 = inlined_call_operand.hbm [shape: f32[8,384], index: 9, kind: output, shape index: {}]  }
   0x1   :  { %15 = vsyncpa [#allocation6], 0 }
   0x2   :  { %16 = vsyncpa [#allocation9], 0 }
   0x3   :  { %17 = vsyncpa [#allocation12], 0 }
   0x4   :  { %18 = vsyncpa [#allocation4], 0  ;;  %s1141_s30 = smov [#allocation5]  }
   0x5   :  { %s34_s10 = sshll.u32 %s1141_s30, 4  ;;  %s35_s10 = int_to_ptr.vmem [resolvable:$true] %s34_s10 }
   0x6   :  { %s999_s11 = scalar_lea.vmem %s35_s10, 2048  ;;  %p1004_p1 = scmp.lt.s32.totalorder %s35_s10, %s35_s10 }
   0x7   :  { %p1000_p0 = scmp.ne.s32.totalorder %s35_s10, %s999_s11  ;;  %p1005_p2 = scmp.lt.s32.totalorder %s999_s11, %s999_s11 }
   0x9   :  { %p1006_p3 = por %p1005_p2, %p1004_p1 }
   0xb   :  { %p1007_p4 = pnand %p1006_p3, %p1000_p0 }
   0xd   :  { %1010 = shalt.err (!%p1007_p4)
}
   0xe   :  { %s1142_s12 = smov 128   ;;  %s1143_s13 = smov 8  }
   0xf   :  { %40 = dma.hbm_to_vmem [thread:$0]  %s1304_s1, 2048, %s35_s10, [#allocation6], %s1142_s12, %s1142_s12, %s1143_s13  }
  0x10   :  { %s1144_s16 = smov [#allocation8]   ;;  %s1145_s18 = smov [#allocation2]  }
  0x11   :  { %s60_s17 = sshll.u32 %s1144_s16, 4  ;;  %s25_s19 = sshll.u32 %s1145_s18, 4  ;;  %s61_s17 = int_to_ptr.vmem [resolvable:$true] %s60_s17  ;;  %s26_s19 = int_to_ptr.vmem [resolvable:$true] %s25_s19 }
  0x12   :  { %s1019_s20 = scalar_lea.vmem %s61_s17, 1024  ;;  %p1024_p6 = scmp.lt.s32.totalorder %s61_s17, %s61_s17 }
  0x13   :  { %p1020_p5 = scmp.ne.s32.totalorder %s61_s17, %s1019_s20  ;;  %p1025_p7 = scmp.lt.s32.totalorder %s1019_s20, %s1019_s20 }
  0x15   :  { %p1026_p8 = por %p1025_p7, %p1024_p6 }
  0x17   :  { %p1027_p9 = pnand %p1026_p8, %p1020_p5 }
  0x19   :  { %1030 = shalt.err (!%p1027_p9)
}
  0x1a   :  { %s1146_s21 = smov 64   ;;  %s1147_s22 = smov 4  }
  0x1b   :  { %66 = dma.hbm_to_vmem [thread:$0]  %s1307_s4, 1024, %s61_s17, [#allocation9], %s1146_s21, %s1146_s21, %s1147_s22  }
  0x1c   :  { %s1039_s1 = scalar_lea.vmem %s26_s19, 64  ;;  %p1044_p11 = scmp.lt.s32.totalorder %s26_s19, %s26_s19 }
  0x1d   :  { %p1040_p10 = scmp.ne.s32.totalorder %s26_s19, %s1039_s1  ;;  %p1045_p12 = scmp.lt.s32.totalorder %s1039_s1, %s1039_s1 }
  0x1f   :  { %p1046_p13 = por %p1045_p12, %p1044_p11 }
  0x21   :  { %p1047_p0 = pnand %p1046_p13, %p1040_p10 }
  0x23   :  { %1050 = shalt.err (!%p1047_p0)
}
  0x24   :  { %28 = dma.hbm_to_vmem [thread:$0]  %s1303_s0, 64, %s26_s19, [#allocation3]  }
  0x25   :  { %s1148_s27 = smov [#allocation7]   ;;  %s1149_s29 = smov [#allocation10]  }
  0x26   :  { %s48_s28 = sshll.u32 %s1148_s27, 4  ;;  %s74_s30 = sshll.u32 %s1149_s29, 4  ;;  %s49_s28 = int_to_ptr.vmem [resolvable:$true] %s48_s28  ;;  %s75_s30 = int_to_ptr.vmem [resolvable:$true] %s74_s30 }
  0x27   :  { %s1059_s10 = scalar_lea.vmem %s49_s28, 1024  ;;  %p1064_p2 = scmp.lt.s32.totalorder %s49_s28, %s49_s28 }
  0x28   :  { %p1060_p1 = scmp.ne.s32.totalorder %s49_s28, %s1059_s10  ;;  %p1065_p3 = scmp.lt.s32.totalorder %s1059_s10, %s1059_s10 }
  0x2a   :  { %p1066_p4 = por %p1065_p3, %p1064_p2 }
  0x2c   :  { %p1067_p5 = pnand %p1066_p4, %p1060_p1 }
  0x2e   :  { %1070 = shalt.err (!%p1067_p5)
}
  0x2f   :  { %54 = dma.hbm_to_vmem [thread:$0]  %s1306_s3, 1024, %s49_s28, [#allocation6], %s1146_s21, %s1146_s21, %s1147_s22  }
  0x30   :  { %s1079_s0 = scalar_lea.vmem %s75_s30, 1024  ;;  %p1084_p7 = scmp.lt.s32.totalorder %s75_s30, %s75_s30 }
  0x31   :  { %p1080_p6 = scmp.ne.s32.totalorder %s75_s30, %s1079_s0  ;;  %p1085_p8 = scmp.lt.s32.totalorder %s1079_s0, %s1079_s0 }
  0x33   :  { %p1086_p9 = por %p1085_p8, %p1084_p7 }
  0x35   :  { %p1087_p10 = pnand %p1086_p9, %p1080_p6 }
  0x37   :  { %1090 = shalt.err (!%p1087_p10)
}
  0x38   :  { %80 = dma.hbm_to_vmem [thread:$0]  %s1309_s6, 1024, %s75_s30, [#allocation9], %s1146_s21, %s1146_s21, %s1147_s22  }
  0x39   :  { %s1150_s14 = smov [#allocation11]  }
  0x3a   :  { %s86_s15 = sshll.u32 %s1150_s14, 4  ;;  %s87_s15 = int_to_ptr.vmem [resolvable:$true] %s86_s15 }
  0x3b   :  { %s1099_s16 = scalar_lea.vmem %s87_s15, 1024  ;;  %p1104_p12 = scmp.lt.s32.totalorder %s87_s15, %s87_s15 }
  0x3c   :  { %p1100_p11 = scmp.ne.s32.totalorder %s87_s15, %s1099_s16  ;;  %p1105_p13 = scmp.lt.s32.totalorder %s1099_s16, %s1099_s16 }
  0x3e   :  { %p1106_p0 = por %p1105_p13, %p1104_p12 }
  0x40   :  { %p1107_p1 = pnand %p1106_p0, %p1100_p11 }
  0x42   :  { %1110 = shalt.err (!%p1107_p1)
}
  0x43   :  { %92 = dma.hbm_to_vmem [thread:$0]  %s1310_s7, 1024, %s87_s15, [#allocation12], %s1146_s21, %s1146_s21, %s1147_s22  }
  0x44   :  { %1131 = dma.done.wait [#allocation3], 64  }
  0x45   :  { %1132 = vsyncadd [#allocation3], 4294967232 }
  0x46   :  { %1133 = dma.done.wait [#allocation6], 3072  }
  0x47   :  { %1134 = vsyncadd [#allocation6], 4294964224 }
  0x48   :  { %1135 = dma.done.wait [#allocation9], 2048  }
  0x49   :  { %1136 = vsyncadd [#allocation9], 4294965248 }
  0x4a   :  { %1137 = dma.done.wait [#allocation12], 1024  }
  0x4b   :  { %1138 = vsyncadd [#allocation12], 4294966272  ;;  %v1151_v0 = vmov 0   ;;  %v927_v1 = vld [vmem:[#allocation5 + $0x74] ss:$8 sps:$4 sm:$0xff]   ;;  %v1152_v19 = vmov 0.0   ;;  %v133_v22 = vlaneseq }
  0x4c   :  { %255 = vmatprep.mubr.bf16.mxu0 %v1151_v0  ;;  %v929_v2 = vld [vmem:[#allocation5 + $0x70] ss:$8 sps:$4 sm:$0xff]   ;;  %223 = vmatprep.subr.bf16.mxu0 %v927_v1  ;;  %v930_v3 = vld [vmem:[#allocation5 + $0x64] ss:$8 sps:$4 sm:$0xff]   ;;  %v932_v4 = vld [vmem:[#allocation5 + $0x60] ss:$8 sps:$4 sm:$0xff]  }
  0x4d   :  { %224 = vmatpush1.bf16.msra.mxu0 %v929_v2  ;;  %v933_v5 = vld [vmem:[#allocation5 + $0x54] ss:$8 sps:$4 sm:$0xff]   ;;  %v935_v6 = vld [vmem:[#allocation5 + $0x50] ss:$8 sps:$4 sm:$0xff]   ;;  %v936_v7 = vld [vmem:[#allocation5 + $0x44] ss:$8 sps:$4 sm:$0xff]   ;;  %833 = vmatprep.subr.bf16.mxu1 %v1152_v19 }
  0x4e   :  { %225 = vmatprep.subr.bf16.mxu0 %v930_v3  ;;  %v938_v8 = vld [vmem:[#allocation5 + $0x40] ss:$8 sps:$4 sm:$0xff]   ;;  %v939_v9 = vld [vmem:[#allocation5 + $0x34] ss:$8 sps:$4 sm:$0xff]   ;;  %v941_v10 = vld [vmem:[#allocation5 + $0x30] ss:$8 sps:$4 sm:$0xff]  }
  0x4f   :  { %v942_v11 = vld [vmem:[#allocation5 + $0x24] ss:$8 sps:$4 sm:$0xff]   ;;  %v944_v12 = vld [vmem:[#allocation5 + $0x20] ss:$8 sps:$4 sm:$0xff]   ;;  %v945_v13 = vld [vmem:[#allocation5 + $0x14] ss:$8 sps:$4 sm:$0xff]  }
  0x50   :  { %v947_v14 = vld [vmem:[#allocation5 + $0x10] ss:$8 sps:$4 sm:$0xff]   ;;  %v948_v15 = vld [vmem:[#allocation5 + $0x4] ss:$8 sps:$4 sm:$0xff]   ;;  %v950_v16 = vld [vmem:[#allocation5] ss:$8 sps:$4 sm:$0xff]  }
  0x51   :  { %226 = vmatpush1.bf16.msra.mxu0 %v932_v4  ;;  %v114_v17 = vld [vmem:[#allocation2] sm:$0xf]  ;;  %v952_v20 = vld [vmem:[#allocation8 + $0x30] sm:$0xff]   ;;  %v953_v21 = vld [vmem:[#allocation8 + $0x28] sm:$0xff]   ;;  %v134_v24 = vshrl.u32 %v133_v22, 7  ;;  %vm1153_vm2 = vmmov 0  }
  0x52   :  { %227 = vmatprep.subr.bf16.mxu0 %v933_v5  ;;  %v951_v18 = vld [vmem:[#allocation8 + $0x38] sm:$0xff]   ;;  %v954_v41 = vld [vmem:[#allocation8 + $0x20] sm:$0xff]   ;;  %849 = vmatprep.mubr.msk.bf16.mxu1 %vm1153_vm2, %v1152_v19  ;;  %v956_v45 = vld [vmem:[#allocation8 + $0x10] sm:$0xff]   ;;  %s1154_s20 = smov [#allocation13]  }
  0x53   :  { %834 = vmatpush3.bf16.msra.mxu1 %v951_v18  ;;  %v1243_v23 = vld [vmem:[%s1308_s5] sm:$0x1]  ;;  %v1246_v25 = vsub.s32 0, %v134_v24  ;;  %v139_v28 = vsub.s32 1, %v134_v24  ;;  %v957_v46 = vld [vmem:[#allocation8 + $0x8] sm:$0xff]   ;;  %v958_v47 = vld [vmem:[#allocation8] sm:$0xff]  }
  0x54   :  { %835 = vmatprep.subr.bf16.mxu1 %v1152_v19  ;;  %vm270_vm0 = vcmp.gt.f32.partialorder %v1243_v23, 0.0  ;;  %v131_v26 = vld [vmem:[%s1305_s2] sm:$0x3]  ;;  %v968_v50 = vld [vmem:[#allocation7 + $0x30] sm:$0xff]   ;;  %v969_v51 = vld [vmem:[#allocation7 + $0x28] sm:$0xff]   ;;  %s736_s21 = sshll.u32 %s1154_s20, 4  ;;  %s737_s21 = int_to_ptr.vmem [resolvable:$true] %s736_s21 }
  0x55   :  { %228 = vmatpush1.bf16.msra.mxu0 %v935_v6  ;;  %v271_v27 = vsel %vm270_vm0, 1, %v1151_v0  ;;  %v136_v29 = vrot.slane %v131_v26, %v1246_v25  ;;  %v140_v31 = vrot.slane %v131_v26, %v139_v28  ;;  %v955_v43 = vld [vmem:[#allocation8 + $0x18] sm:$0xff]   ;;  %v970_v52 = vld [vmem:[#allocation7 + $0x20] sm:$0xff]   ;;  %v972_v54 = vld [vmem:[#allocation7 + $0x10] sm:$0xff]   ;;  %v287_v59 = vrot.slane %v1243_v23, %v1246_v25  ;;  %s1111_s22 = scalar_lea.vmem %s737_s21, 384  ;;  %p1116_p3 = scmp.lt.s32.totalorder %s737_s21, %s737_s21 }
  0x56   :  { %229 = vmatprep.subr.bf16.mxu0 %v936_v7  ;;  %v275_v30 = vrot.slane %v271_v27, %v1246_v25  ;;  %v967_v49 = vld [vmem:[#allocation7 + $0x38] sm:$0xff]   ;;  %v973_v55 = vld [vmem:[#allocation7 + $0x8] sm:$0xff]   ;;  %v960_v0 = vld [vmem:[#allocation10 + $0x30] sm:$0xff]   ;;  %p1112_p2 = scmp.ne.s32.totalorder %s737_s21, %s1111_s22  ;;  %p1117_p4 = scmp.lt.s32.totalorder %s1111_s22, %s1111_s22 }
  0x57   :  { %836 = vmatpush3.bf16.msra.mxu1 %v952_v20  ;;  %v971_v53 = vld [vmem:[#allocation7 + $0x18] sm:$0xff]   ;;  %v961_v1 = vld [vmem:[#allocation10 + $0x28] sm:$0xff]   ;;  %v962_v2 = vld [vmem:[#allocation10 + $0x20] sm:$0xff]  }
  0x58   :  { %837 = vmatprep.subr.bf16.mxu1 %v1152_v19  ;;  %vm276_vm1 = vcmp.eq.s32.totalorder %v275_v30, 1  ;;  %v959_v62 = vld [vmem:[#allocation10 + $0x38] sm:$0xff]   ;;  %v964_v4 = vld [vmem:[#allocation10 + $0x10] sm:$0xff]   ;;  %v965_v5 = vld [vmem:[#allocation10 + $0x8] sm:$0xff]   ;;  %p1118_p5 = por %p1117_p4, %p1116_p3 }
  0x59   :  { %230 = vmatpush1.bf16.msra.mxu0 %v938_v8  ;;  %v963_v3 = vld [vmem:[#allocation10 + $0x18] sm:$0xff]   ;;  %v966_v6 = vld [vmem:[#allocation10] sm:$0xff]   ;;  %v980_v26 = vld [vmem:[#allocation11 + $0x10] sm:$0xff]  }
  0x5a   :  { %231 = vmatprep.subr.bf16.mxu0 %v939_v9  ;;  %v974_v8 = vld [vmem:[#allocation7] sm:$0xff]   ;;  %v979_v24 = vld [vmem:[#allocation11 + $0x18] sm:$0xff]   ;;  %v981_v27 = vld [vmem:[#allocation11 + $0x8] sm:$0xff]   ;;  %p1119_p6 = pnand %p1118_p5, %p1112_p2 }
  0x5b   :  { %838 = vmatpush3.bf16.msra.mxu1 %v953_v21  ;;  %v978_v22 = vld [vmem:[#allocation11 + $0x20] sm:$0xff]  }
  0x5c   :  { %839 = vmatprep.subr.bf16.mxu1 %v1152_v19  ;;  %v982_v28 = vld [vmem:[#allocation11] sm:$0xff]  }
  0x5d   :  { %232 = vmatpush1.bf16.msra.mxu0 %v941_v10  ;;  %v975_v10 = vld [vmem:[#allocation11 + $0x38] sm:$0xff]  }
  0x5e   :  { %233 = vmatprep.subr.bf16.mxu0 %v942_v11 }
  0x5f   :  { %840 = vmatpush3.bf16.msra.mxu1 %v954_v41 }
  0x60   :  { %841 = vmatprep.subr.bf16.mxu1 %v1152_v19 }
  0x61   :  { %234 = vmatpush1.bf16.msra.mxu0 %v944_v12 }
  0x62   :  { %235 = vmatprep.subr.bf16.mxu0 %v945_v13 }
  0x63   :  { %842 = vmatpush3.bf16.msra.mxu1 %v955_v43 }
  0x64   :  { %843 = vmatprep.subr.bf16.mxu1 %v1152_v19 }
  0x65   :  { %236 = vmatpush1.bf16.msra.mxu0 %v947_v14  ;;  %v976_v14 = vld [vmem:[#allocation11 + $0x30] sm:$0xff]  }
  0x66   :  { %237 = vmatprep.subr.bf16.mxu0 %v948_v15 }
  0x67   :  { %844 = vmatpush3.bf16.msra.mxu1 %v956_v45 }
  0x68   :  { %845 = vmatprep.subr.bf16.mxu1 %v1152_v19 }
  0x69   :  { %238 = vmatpush1.bf16.msra.mxu0 %v950_v16  ;;  %v977_v16 = vld [vmem:[#allocation11 + $0x28] sm:$0xff]  }
  0x6a   :  { %853 = vmatprep.subr.bf16.mxu0 %v1152_v19 }
  0x6b   :  { %846 = vmatpush3.bf16.msra.mxu1 %v957_v46 }
  0x6c   :  { %256 = vmatmul.mubr.bf16.vlgmr.msra.gmra.mxu0 %v114_v17  ;;  %847 = vmatprep.subr.bf16.mxu1 %v1152_v19 }
  0x6d   :  { %869 = vmatprep.mubr.msk.bf16.mxu0 %vm1153_vm2, %v1152_v19  ;;  %854 = vmatpush3.bf16.msra.mxu0 %v967_v49 }
  0x6e   :  { %855 = vmatprep.subr.bf16.mxu0 %v1152_v19 }
  0x6f   :  { %848 = vmatpush3.bf16.msra.mxu1 %v958_v47 }
  0x70   :  { %873 = vmatprep.subr.bf16.mxu1 %v1152_v19 }
  0x71   :  { %856 = vmatpush3.bf16.msra.mxu0 %v968_v50 }
  0x72   :  { %857 = vmatprep.subr.bf16.mxu0 %v1152_v19 }
  0x75   :  { %858 = vmatpush3.bf16.msra.mxu0 %v969_v51 }
  0x76   :  { %859 = vmatprep.subr.bf16.mxu0 %v1152_v19 }
  0x79   :  { %860 = vmatpush3.bf16.msra.mxu0 %v970_v52 }
  0x7a   :  { %861 = vmatprep.subr.bf16.mxu0 %v1152_v19 }
  0x7d   :  { %862 = vmatpush3.bf16.msra.mxu0 %v971_v53 }
  0x7e   :  { %863 = vmatprep.subr.bf16.mxu0 %v1152_v19 }
  0x81   :  { %864 = vmatpush3.bf16.msra.mxu0 %v972_v54 }
  0x82   :  { %865 = vmatprep.subr.bf16.mxu0 %v1152_v19 }
  0x85   :  { %866 = vmatpush3.bf16.msra.mxu0 %v973_v55 }
  0x86   :  { %867 = vmatprep.subr.bf16.mxu0 %v1152_v19 }
  0x89   :  { %868 = vmatpush3.bf16.msra.mxu0 %v974_v8 }
  0x8a   :  { %893 = vmatprep.subr.bf16.mxu0 %v1152_v19 }
 0x12c   :  { %v257_v32 = vpop.f32.mrf.mxu0 }
 0x12d   :  { %v258_v33 = vadd.f32 %v257_v32, %v136_v29  ;;  %v412_v29 = vsub.f32 1.0, %v1243_v23 }
 0x12e   :  { %v259_v34 = vpop.f32.mrf.mxu0 }
 0x12f   :  { %v264_v35 = vsub.f32 0.0, %v258_v33  ;;  %v260_v36 = vadd.f32 %v259_v34, %v140_v31  ;;  %v417_v30 = vrot.slane %v412_v29, %v1246_v25 }
 0x130   :  { %v261_v37 = vpop.f32.mrf.mxu0 }
 0x131   :  { %v265_v38 = vmul.f32 1.442695, %v264_v35  ;;  %v277_v39 = vsel %vm276_vm1, %v260_v36, -1e+30 }
 0x132   :  { %v262_v40 = vpop.f32.mrf.mxu0  ;;  %278 = vmax.xlane.f32.xlu0 %v277_v39 }
 0x133   :  { %983 = vpow2.f32 %v265_v38 }
 0x140   :  { %v984_v42 = vpop.eup %983 }
 0x141   :  { %v267_v44 = vadd.f32 1.0, %v984_v42 }
 0x143   :  { %985 = vrcp.f32 %v267_v44 }
 0x150   :  { %v986_v48 = vpop.eup %985 }
 0x151   :  { %727 = vst [vmem:[#allocation13] sm:$0xff] %v986_v48  ;;  %v509_v7 = vpack.c.bf16 %v986_v48, %v986_v48 }
 0x1bb   :  { %v279_v56 = vpop.xlane.xlu0 %278 }
 0x1bc   :  { %v280_v57 = vsub.f32 %v260_v36, %v279_v56 }
 0x1be   :  { %v281_v58 = vmul.f32 1.442695, %v280_v57 }
 0x1c0   :  { %987 = vpow2.f32 %v281_v58 }
 0x1cd   :  { %v988_v60 = vpop.eup %987 }
 0x1ce   :  { %v1271_v61 = vmul.f32 %v988_v60, %v287_v59 }
 0x1d0   :  { %v290_v63 = vpack.c.bf16 %v1271_v61, %v1271_v61 }
 0x1d2   :  { %850 = vmatmul.mubr.bf16.vlgmr.msra.gmra.mxu1 %v290_v63 }
 0x1d3   :  { %874 = vmatpush3.bf16.msra.mxu1 %v959_v62  ;;  %889 = vmatprep.mubr.msk.bf16.mxu1 %vm1153_vm2, %v1152_v19 }
 0x1d4   :  { %875 = vmatprep.subr.bf16.mxu1 %v1152_v19 }
 0x1d7   :  { %876 = vmatpush3.bf16.msra.mxu1 %v960_v0 }
 0x1d8   :  { %877 = vmatprep.subr.bf16.mxu1 %v1152_v19 }
 0x1db   :  { %878 = vmatpush3.bf16.msra.mxu1 %v961_v1 }
 0x1dc   :  { %879 = vmatprep.subr.bf16.mxu1 %v1152_v19 }
 0x1df   :  { %880 = vmatpush3.bf16.msra.mxu1 %v962_v2 }
 0x1e0   :  { %881 = vmatprep.subr.bf16.mxu1 %v1152_v19 }
 0x1e3   :  { %882 = vmatpush3.bf16.msra.mxu1 %v963_v3 }
 0x1e4   :  { %883 = vmatprep.subr.bf16.mxu1 %v1152_v19 }
 0x1e7   :  { %884 = vmatpush3.bf16.msra.mxu1 %v964_v4 }
 0x1e8   :  { %885 = vmatprep.subr.bf16.mxu1 %v1152_v19 }
 0x1eb   :  { %886 = vmatpush3.bf16.msra.mxu1 %v965_v5 }
 0x1ec   :  { %887 = vmatprep.subr.bf16.mxu1 %v1152_v19 }
 0x1ef   :  { %888 = vmatpush3.bf16.msra.mxu1 %v966_v6 }
 0x1f2   :  { %890 = vmatmul.mubr.bf16.vlgmr.msra.gmra.mxu1 %v509_v7 }
 0x292   :  { %v389_v9 = vpop.f32.mrf.mxu1 }
 0x293   :  { %v395_v11 = vpack.c.bf16 %v389_v9, %v389_v9 }
 0x294   :  { %v851_v12 = vpop.f32.mrf.mxu1 }
 0x295   :  { %870 = vmatmul.mubr.bf16.vlgmr.msra.gmra.mxu0 %v395_v11 }
 0x296   :  { %v392_v13 = vpop.f32.mrf.mxu1  ;;  %894 = vmatpush3.bf16.msra.mxu0 %v975_v10  ;;  %909 = vmatprep.mubr.msk.bf16.mxu0 %vm1153_vm2, %v1152_v19 }
 0x297   :  { %895 = vmatprep.subr.bf16.mxu0 %v1152_v19 }
 0x298   :  { %v852_v15 = vpop.f32.mrf.mxu1 }
 0x29a   :  { %896 = vmatpush3.bf16.msra.mxu0 %v976_v14 }
 0x29b   :  { %897 = vmatprep.subr.bf16.mxu0 %v1152_v19 }
 0x29e   :  { %898 = vmatpush3.bf16.msra.mxu0 %v977_v16 }
 0x29f   :  { %899 = vmatprep.subr.bf16.mxu0 %v1152_v19 }
 0x2a2   :  { %900 = vmatpush3.bf16.msra.mxu0 %v978_v22 }
 0x2a3   :  { %901 = vmatprep.subr.bf16.mxu0 %v1152_v19 }
 0x2a6   :  { %902 = vmatpush3.bf16.msra.mxu0 %v979_v24 }
 0x2a7   :  { %903 = vmatprep.subr.bf16.mxu0 %v1152_v19 }
 0x2aa   :  { %904 = vmatpush3.bf16.msra.mxu0 %v980_v26 }
 0x2ab   :  { %905 = vmatprep.subr.bf16.mxu0 %v1152_v19 }
 0x2ae   :  { %906 = vmatpush3.bf16.msra.mxu0 %v981_v27 }
 0x2af   :  { %907 = vmatprep.subr.bf16.mxu0 %v1152_v19  ;;  %v788_v19 = vld [vmem:[%s1311_s8] ss:$0 sm:$0xff] }
 0x2b2   :  { %v608_v17 = vpop.f32.mrf.mxu1  ;;  %908 = vmatpush3.bf16.msra.mxu0 %v982_v28 }
 0x2b4   :  { %v891_v18 = vpop.f32.mrf.mxu1 }
 0x2b6   :  { %v611_v20 = vpop.f32.mrf.mxu1 }
 0x2b8   :  { %v892_v21 = vpop.f32.mrf.mxu1 }
 0x355   :  { %v501_v31 = vpop.f32.mrf.mxu0 }
 0x356   :  { %v502_v32 = vadd.f32 %v501_v31, %v417_v30 }
 0x357   :  { %v871_v33 = vpop.f32.mrf.mxu0 }
 0x358   :  { %989 = vrcp.f32 %v502_v32 }
 0x359   :  { %v504_v34 = vpop.f32.mrf.mxu0 }
 0x35b   :  { %v872_v35 = vpop.f32.mrf.mxu0 }
 0x365   :  { %v990_v36 = vpop.eup %989 }
 0x366   :  { %v508_v37 = vmul.f32 %v990_v36, %v1271_v61 }
 0x368   :  { %v614_v38 = vpack.c.bf16 %v508_v37, %v508_v37  ;;  %728 = vst [vmem:[#allocation13 + $0x8] sm:$0xff] %v508_v37 }
 0x36a   :  { %910 = vmatmul.mubr.bf16.vlgmr.msra.gmra.mxu0 %v614_v38 }
 0x42a   :  { %v720_v39 = vpop.f32.mrf.mxu0 }
 0x42b   :  { %v721_v23 = vadd.f32 %v788_v19, %v720_v39 }
 0x42c   :  { %v911_v25 = vpop.f32.mrf.mxu0 }
 0x42d   :  { %v726_v40 = vmul.f32 %v721_v23, %v608_v17 }
 0x42e   :  { %v723_v41 = vpop.f32.mrf.mxu0 }
 0x42f   :  { %729 = vst [vmem:[#allocation13 + $0x10] sm:$0xff] %v726_v40 }
 0x430   :  { %v912_v42 = vpop.f32.mrf.mxu0 }
 0x431   :  { %1122 = shalt.err (!%p1119_p6)
}
 0x432   :  { %739 = dma.vmem_to_hbm [thread:$0]  %s737_s21, 384, %s1312_s9, [#allocation4]  }
 0x433   :  { %1139 = dma.done.wait [#allocation4], 384  }
 0x434   :  { %1140 = vsyncadd [#allocation4], 4294966912 }
 0x435   :  { %743 = vsyncpa [#allocation3], 1 }
 0x436   :  { %744 = vsyncpa [#allocation6], 1 }
 0x437   :  { %745 = vsyncpa [#allocation9], 1 }
 0x438   :  { %746 = vsyncpa [#allocation12], 1 }
 0x439   :  { %747 = vsyncpa [#allocation4], 1 }

</bundles_post_ra>
